<compile_context>
chip_gen: v7x
topology: tpu7x:2x2x1
jax: 0.10.0
libtpu: 0.0.40
codegen_flags: <defaults>
</compile_context>

<pallas_src>
import functools

import jax
import jax.numpy as jnp
from jax.experimental import pallas as pl


NUM_CLASSES = 10


# ------------------------------ fused kernel --------------------------------

def _net_kernel(x_ref, *refs, seq_len, batch, hidden, num_layers):
    """Fused LSTM stack + FC + softmax.

    x_ref    : (T, Bp, D)  time-major, batch-padded input (f32)
    per layer: wx (D_l, 4H) bf16, wh (H, 4H) bf16, b (1, 4H) f32  [b_ih + b_hh]
    fcw      : (H, 128) bf16 (zero-padded cols), fcb: (1, 128) f32 (-1e30 pad)
    out_ref  : (Bp, 128) f32 softmax probabilities (padded lanes == 0)
    """
    T, Bp, H = seq_len, batch, hidden
    layer_refs = refs[:3 * num_layers]
    fcw_ref, fcb_ref, out_ref = refs[3 * num_layers:]

    # Hoist all weight loads out of the unrolled recurrence.
    w = [(layer_refs[3 * l][...], layer_refs[3 * l + 1][...],
          layer_refs[3 * l + 2][...]) for l in range(num_layers)]
    fcw = fcw_ref[...]
    fcb = fcb_ref[...]

    # Lane mask selecting the g-gate (tanh) lanes of the [i|f|g|o] gate vreg.
    lane = jax.lax.broadcasted_iota(jnp.int32, (Bp, 4 * H), 1)
    g_lanes = (lane >= 2 * H) & (lane < 3 * H)

    def cell(gates, c_prev):
        # Full-vreg nonlinearities: one sigmoid + one tanh pass over all 4H
        # lanes (2 EUP ops) instead of one transcendental per gate slice.
        act = jnp.where(g_lanes, jnp.tanh(gates), jax.nn.sigmoid(gates))
        i_g = act[:, 0 * H:1 * H]
        f_g = act[:, 1 * H:2 * H]
        g_g = act[:, 2 * H:3 * H]
        o_g = act[:, 3 * H:4 * H]
        c_new = f_g * c_prev + i_g * g_g
        h_new = o_g * jnp.tanh(c_new)
        return h_new, c_new

    h = [jnp.zeros((Bp, H), jnp.float32) for _ in range(num_layers)]  # h0 = 0
    c = [jnp.zeros((Bp, H), jnp.float32) for _ in range(num_layers)]  # c0 = 0

    # Fully-unrolled wavefront: all layers advance inside one time loop, so
    # layer l's step t only depends on (layer l-1, step t) and (layer l,
    # step t-1); the LLO scheduler interleaves the per-layer chains and no
    # hidden-sequence ever touches VMEM.
    for t in range(T):
        x_in = x_ref[t].astype(jnp.bfloat16)            # (Bp, D); off the chain
        for l in range(num_layers):
            wx, wh, b = w[l]
            gates = (
                jnp.dot(x_in, wx, preferred_element_type=jnp.float32)
                + jnp.dot(h[l].astype(jnp.bfloat16), wh,
                          preferred_element_type=jnp.float32)
                + b)
            h[l], c[l] = cell(gates, c[l])
            if l + 1 < num_layers:
                x_in = h[l].astype(jnp.bfloat16)

    # FC(H -> 128 padded lanes) + softmax on the last hidden state.
    logits = jnp.dot(h[-1].astype(jnp.bfloat16), fcw,
                     preferred_element_type=jnp.float32) + fcb
    m = jnp.max(logits, axis=-1, keepdims=True)
    e = jnp.exp(logits - m)                 # padded lanes: exp(-1e30 - m) == 0
    denom = jnp.sum(e, axis=-1, keepdims=True)
    out_ref[...] = e * pl.reciprocal(denom, approx=True)


# --------------------------- one-time param prep -----------------------------

def prepare_params(params, n_out_pad=128):
    """One-time layout plumbing (hoisted out of the per-call path).

    Transposes weights so the gate matmul output is lane-dense, folds the two
    LSTM biases, casts matmul operands to bf16, and pads the FC layer to 128
    output lanes (zero weight columns, -1e30 bias) for a lane-dense epilogue.
    """
    prep = []
    for (w_ih, w_hh, b_ih, b_hh) in params["lstm"]:
        prep.append(jnp.asarray(w_ih.T, jnp.bfloat16))                 # (D_l, 4H)
        prep.append(jnp.asarray(w_hh.T, jnp.bfloat16))                 # (H, 4H)
        prep.append(jnp.asarray((b_ih + b_hh)[None, :], jnp.float32))  # (1, 4H)
    n_out, H = params["fc_w"].shape
    n_pad = max(n_out_pad, ((n_out + 127) // 128) * 128)
    fcw = jnp.zeros((H, n_pad), jnp.float32).at[:, :n_out].set(params["fc_w"].T)
    fcb = jnp.full((1, n_pad), -1e30, jnp.float32).at[0, :n_out].set(params["fc_b"])
    prep.append(fcw.astype(jnp.bfloat16))
    prep.append(fcb)
    return tuple(prep)


# ------------------------------- Net forward --------------------------------

def net_forward(x, prep):
    """x: (B, T, input_size) -> (B, NUM_CLASSES) softmax probabilities."""
    B, T, _ = x.shape
    num_layers = (len(prep) - 2) // 3
    H = prep[1].shape[0]                    # w_hh.T: (H, 4H)
    n_pad = prep[-1].shape[1]

    # Pad batch to the f32 sublane tile (8); padded rows are sliced off below.
    Bp = ((B + 7) // 8) * 8
    x_tm = jnp.transpose(x, (1, 0, 2)).astype(jnp.float32)      # (T, B, D)
    x_tm = jnp.pad(x_tm, ((0, 0), (0, Bp - B), (0, 0)))         # (T, Bp, D)

    kernel = functools.partial(
        _net_kernel, seq_len=T, batch=Bp, hidden=H, num_layers=num_layers)
    out = pl.pallas_call(
        kernel,
        out_shape=jax.ShapeDtypeStruct((Bp, n_pad), jnp.float32),
    )(x_tm, *prep)
    return out[:B, :NUM_CLASSES]


# --------------------------- init & pure-JAX reference ----------------------

def init_params(key, input_size, hidden_size, num_layers, num_classes=NUM_CLASSES):
    """Deterministic PyTorch-style uniform(-1/sqrt(H), 1/sqrt(H)) init."""
    params = {"lstm": []}
    bound = 1.0 / jnp.sqrt(jnp.float32(hidden_size))
    d_in = input_size
    for _ in range(num_layers):
        key, k1, k2, k3, k4 = jax.random.split(key, 5)
        w_ih = jax.random.uniform(k1, (4 * hidden_size, d_in), jnp.float32, -bound, bound)
        w_hh = jax.random.uniform(k2, (4 * hidden_size, hidden_size), jnp.float32, -bound, bound)
        b_ih = jax.random.uniform(k3, (4 * hidden_size,), jnp.float32, -bound, bound)
        b_hh = jax.random.uniform(k4, (4 * hidden_size,), jnp.float32, -bound, bound)
        params["lstm"].append((w_ih, w_hh, b_ih, b_hh))
        d_in = hidden_size
    key, kw, kb = jax.random.split(key, 3)
    params["fc_w"] = jax.random.uniform(kw, (num_classes, hidden_size), jnp.float32, -bound, bound)
    params["fc_b"] = jax.random.uniform(kb, (num_classes,), jnp.float32, -bound, bound)
    return params


def net_reference(x, params):
    """Pure-JAX f32 reference of the PyTorch Net forward pass."""
    B, T, _ = x.shape
    seq = x.astype(jnp.float32)
    for (w_ih, w_hh, b_ih, b_hh) in params["lstm"]:
        H = w_hh.shape[1]
        h = jnp.zeros((B, H), jnp.float32)
        c = jnp.zeros((B, H), jnp.float32)
        outs = []
        for t in range(T):
            gates = seq[:, t, :] @ w_ih.T + h @ w_hh.T + b_ih + b_hh
            i_g = jax.nn.sigmoid(gates[:, 0 * H:1 * H])
            f_g = jax.nn.sigmoid(gates[:, 1 * H:2 * H])
            g_g = jnp.tanh(gates[:, 2 * H:3 * H])
            o_g = jax.nn.sigmoid(gates[:, 3 * H:4 * H])
            c = f_g * c + i_g * g_g
            h = o_g * jnp.tanh(c)
            outs.append(h)
        seq = jnp.stack(outs, axis=1)
    logits = seq[:, -1, :] @ params["fc_w"].T + params["fc_b"]
    return jax.nn.softmax(logits, axis=-1)


# ----------------------------------- main ------------------------------------

if __name__ == "__main__":
    B, T = 2, 8
    input_size, hidden_size, num_layers = 16, 32, 2

    key = jax.random.PRNGKey(0)
    k_x, k_p = jax.random.split(key)
    x = jax.random.normal(k_x, (B, T, input_size), dtype=jnp.float32)
    params = init_params(k_p, input_size, hidden_size, num_layers)

    prep = prepare_params(params)          # layout plumbing done once, not per call
    fwd = jax.jit(net_forward)
    out = jax.block_until_ready(fwd(x, prep))

    assert out.shape == (B, NUM_CLASSES)
    # softmax rows sum to 1 (approx reciprocal in the epilogue -> small slack)
    assert bool(jnp.all(jnp.abs(jnp.sum(out, axis=1) - 1.0) < 5e-3))
    # cross-check against the pure-f32 JAX reference; tolerance covers the
    # bf16 MXU operands + approx reciprocal (observed error is well below).
    ref = net_reference(x, params)
    assert bool(jnp.allclose(out, ref, atol=2e-2)), "mismatch vs JAX reference"
    print("KERNEL_OK")
</pallas_src>

<mosaic_0001>
module attributes {stable_mosaic.version = 11 : i64} {
  func.func @_net_kernel(%arg0: memref<8x8x16xf32, #tpu.memory_space<vmem>>, %arg1: memref<16x128xbf16, #tpu.memory_space<vmem>>, %arg2: memref<32x128xbf16, #tpu.memory_space<vmem>>, %arg3: memref<1x128xf32, #tpu.memory_space<vmem>>, %arg4: memref<32x128xbf16, #tpu.memory_space<vmem>>, %arg5: memref<32x128xbf16, #tpu.memory_space<vmem>>, %arg6: memref<1x128xf32, #tpu.memory_space<vmem>>, %arg7: memref<32x128xbf16, #tpu.memory_space<vmem>>, %arg8: memref<1x128xf32, #tpu.memory_space<vmem>>, %arg9: memref<8x128xf32, #tpu.memory_space<vmem>>) attributes {dimension_semantics = [], scalar_prefetch = 0 : i64, scratch_operands = 0 : i64, tpu.core_type = #tpu.core_type<tc>} {
    %c0 = arith.constant 0 : index
    %c0_0 = arith.constant 0 : index
    %0 = vector.load %arg1[%c0, %c0_0] : memref<16x128xbf16, #tpu.memory_space<vmem>>, vector<16x128xbf16>
    %c0_1 = arith.constant 0 : index
    %c0_2 = arith.constant 0 : index
    %1 = vector.load %arg2[%c0_1, %c0_2] : memref<32x128xbf16, #tpu.memory_space<vmem>>, vector<32x128xbf16>
    %c0_3 = arith.constant 0 : index
    %c0_4 = arith.constant 0 : index
    %2 = vector.load %arg3[%c0_3, %c0_4] : memref<1x128xf32, #tpu.memory_space<vmem>>, vector<1x128xf32>
    %c0_5 = arith.constant 0 : index
    %c0_6 = arith.constant 0 : index
    %3 = vector.load %arg4[%c0_5, %c0_6] : memref<32x128xbf16, #tpu.memory_space<vmem>>, vector<32x128xbf16>
    %c0_7 = arith.constant 0 : index
    %c0_8 = arith.constant 0 : index
    %4 = vector.load %arg5[%c0_7, %c0_8] : memref<32x128xbf16, #tpu.memory_space<vmem>>, vector<32x128xbf16>
    %c0_9 = arith.constant 0 : index
    %c0_10 = arith.constant 0 : index
    %5 = vector.load %arg6[%c0_9, %c0_10] : memref<1x128xf32, #tpu.memory_space<vmem>>, vector<1x128xf32>
    %c0_11 = arith.constant 0 : index
    %c0_12 = arith.constant 0 : index
    %6 = vector.load %arg7[%c0_11, %c0_12] : memref<32x128xbf16, #tpu.memory_space<vmem>>, vector<32x128xbf16>
    %c0_13 = arith.constant 0 : index
    %c0_14 = arith.constant 0 : index
    %7 = vector.load %arg8[%c0_13, %c0_14] : memref<1x128xf32, #tpu.memory_space<vmem>>, vector<1x128xf32>
    %8 = tpu.iota {dimensions = array<i32: 1>} : vector<8x128xi32>
    %c64_i32 = arith.constant 64 : i32
    %9 = vector.broadcast %c64_i32 : i32 to vector<8x128xi32>
    %10 = arith.cmpi sge, %8, %9 : vector<8x128xi32>
    %c96_i32 = arith.constant 96 : i32
    %11 = vector.broadcast %c96_i32 : i32 to vector<8x128xi32>
    %12 = arith.cmpi slt, %8, %11 : vector<8x128xi32>
    %13 = arith.andi %10, %12 : vector<8x128xi1>
    %cst = arith.constant 0.000000e+00 : f32
    %14 = vector.broadcast %cst : f32 to vector<8x32xf32>
    %cst_15 = arith.constant 0.000000e+00 : f32
    %15 = vector.broadcast %cst_15 : f32 to vector<8x32xf32>
    %cst_16 = arith.constant 0.000000e+00 : f32
    %16 = vector.broadcast %cst_16 : f32 to vector<8x32xf32>
    %cst_17 = arith.constant 0.000000e+00 : f32
    %17 = vector.broadcast %cst_17 : f32 to vector<8x32xf32>
    %c0_18 = arith.constant 0 : index
    %c0_19 = arith.constant 0 : index
    %c0_20 = arith.constant 0 : index
    %18 = vector.load %arg0[%c0_18, %c0_19, %c0_20] : memref<8x8x16xf32, #tpu.memory_space<vmem>>, vector<1x8x16xf32>
    %19 = vector.shape_cast %18 : vector<1x8x16xf32> to vector<8x16xf32>
    %20 = arith.truncf %19 : vector<8x16xf32> to vector<8x16xbf16>
    %cst_21 = arith.constant dense<0.000000e+00> : vector<8x128xf32>
    %21 = tpu.matmul %20, %0, %cst_21 {dimension_numbers = #tpu.dot_dimension_numbers<[1], [0], [0], [1], [0, 0, 1, 1], [], []>} : vector<8x16xbf16>, vector<16x128xbf16>, vector<8x128xf32> -> vector<8x128xf32>
    %22 = arith.truncf %14 : vector<8x32xf32> to vector<8x32xbf16>
    %cst_22 = arith.constant dense<0.000000e+00> : vector<8x128xf32>
    %23 = tpu.matmul %22, %1, %cst_22 {dimension_numbers = #tpu.dot_dimension_numbers<[1], [0], [0], [1], [0, 0, 1, 1], [], []>} : vector<8x32xbf16>, vector<32x128xbf16>, vector<8x128xf32> -> vector<8x128xf32>
    %24 = arith.addf %21, %23 : vector<8x128xf32>
    %25 = vector.broadcast %2 : vector<1x128xf32> to vector<8x128xf32>
    %26 = arith.addf %24, %25 : vector<8x128xf32>
    %27 = math.tanh %26 : vector<8x128xf32>
    %28 = arith.negf %26 : vector<8x128xf32>
    %29 = math.exp %28 : vector<8x128xf32>
    %cst_23 = arith.constant 1.000000e+00 : f32
    %30 = vector.broadcast %cst_23 : f32 to vector<8x128xf32>
    %31 = arith.addf %30, %29 : vector<8x128xf32>
    %32 = arith.divf %30, %31 : vector<8x128xf32>
    %33 = arith.select %13, %27, %32 : vector<8x128xi1>, vector<8x128xf32>
    %34 = vector.extract_strided_slice %33 {offsets = [0, 0], sizes = [8, 32], strides = [1, 1]} : vector<8x128xf32> to vector<8x32xf32>
    %35 = vector.extract_strided_slice %33 {offsets = [0, 32], sizes = [8, 32], strides = [1, 1]} : vector<8x128xf32> to vector<8x32xf32>
    %36 = vector.extract_strided_slice %33 {offsets = [0, 64], sizes = [8, 32], strides = [1, 1]} : vector<8x128xf32> to vector<8x32xf32>
    %37 = vector.extract_strided_slice %33 {offsets = [0, 96], sizes = [8, 32], strides = [1, 1]} : vector<8x128xf32> to vector<8x32xf32>
    %38 = arith.mulf %35, %16 : vector<8x32xf32>
    %39 = arith.mulf %34, %36 : vector<8x32xf32>
    %40 = arith.addf %38, %39 : vector<8x32xf32>
    %41 = math.tanh %40 : vector<8x32xf32>
    %42 = arith.mulf %37, %41 : vector<8x32xf32>
    %43 = arith.truncf %42 : vector<8x32xf32> to vector<8x32xbf16>
    %cst_24 = arith.constant dense<0.000000e+00> : vector<8x128xf32>
    %44 = tpu.matmul %43, %3, %cst_24 {dimension_numbers = #tpu.dot_dimension_numbers<[1], [0], [0], [1], [0, 0, 1, 1], [], []>} : vector<8x32xbf16>, vector<32x128xbf16>, vector<8x128xf32> -> vector<8x128xf32>
    %45 = arith.truncf %15 : vector<8x32xf32> to vector<8x32xbf16>
    %cst_25 = arith.constant dense<0.000000e+00> : vector<8x128xf32>
    %46 = tpu.matmul %45, %4, %cst_25 {dimension_numbers = #tpu.dot_dimension_numbers<[1], [0], [0], [1], [0, 0, 1, 1], [], []>} : vector<8x32xbf16>, vector<32x128xbf16>, vector<8x128xf32> -> vector<8x128xf32>
    %47 = arith.addf %44, %46 : vector<8x128xf32>
    %48 = vector.broadcast %5 : vector<1x128xf32> to vector<8x128xf32>
    %49 = arith.addf %47, %48 : vector<8x128xf32>
    %50 = math.tanh %49 : vector<8x128xf32>
    %51 = arith.negf %49 : vector<8x128xf32>
    %52 = math.exp %51 : vector<8x128xf32>
    %cst_26 = arith.constant 1.000000e+00 : f32
    %53 = vector.broadcast %cst_26 : f32 to vector<8x128xf32>
    %54 = arith.addf %53, %52 : vector<8x128xf32>
    %55 = arith.divf %53, %54 : vector<8x128xf32>
    %56 = arith.select %13, %50, %55 : vector<8x128xi1>, vector<8x128xf32>
    %57 = vector.extract_strided_slice %56 {offsets = [0, 0], sizes = [8, 32], strides = [1, 1]} : vector<8x128xf32> to vector<8x32xf32>
    %58 = vector.extract_strided_slice %56 {offsets = [0, 32], sizes = [8, 32], strides = [1, 1]} : vector<8x128xf32> to vector<8x32xf32>
    %59 = vector.extract_strided_slice %56 {offsets = [0, 64], sizes = [8, 32], strides = [1, 1]} : vector<8x128xf32> to vector<8x32xf32>
    %60 = vector.extract_strided_slice %56 {offsets = [0, 96], sizes = [8, 32], strides = [1, 1]} : vector<8x128xf32> to vector<8x32xf32>
    %61 = arith.mulf %58, %17 : vector<8x32xf32>
    %62 = arith.mulf %57, %59 : vector<8x32xf32>
    %63 = arith.addf %61, %62 : vector<8x32xf32>
    %64 = math.tanh %63 : vector<8x32xf32>
    %65 = arith.mulf %60, %64 : vector<8x32xf32>
    %c1 = arith.constant 1 : index
    %c0_27 = arith.constant 0 : index
    %c0_28 = arith.constant 0 : index
    %66 = vector.load %arg0[%c1, %c0_27, %c0_28] : memref<8x8x16xf32, #tpu.memory_space<vmem>>, vector<1x8x16xf32>
    %67 = vector.shape_cast %66 : vector<1x8x16xf32> to vector<8x16xf32>
    %68 = arith.truncf %67 : vector<8x16xf32> to vector<8x16xbf16>
    %cst_29 = arith.constant dense<0.000000e+00> : vector<8x128xf32>
    %69 = tpu.matmul %68, %0, %cst_29 {dimension_numbers = #tpu.dot_dimension_numbers<[1], [0], [0], [1], [0, 0, 1, 1], [], []>} : vector<8x16xbf16>, vector<16x128xbf16>, vector<8x128xf32> -> vector<8x128xf32>
    %70 = arith.truncf %42 : vector<8x32xf32> to vector<8x32xbf16>
    %cst_30 = arith.constant dense<0.000000e+00> : vector<8x128xf32>
    %71 = tpu.matmul %70, %1, %cst_30 {dimension_numbers = #tpu.dot_dimension_numbers<[1], [0], [0], [1], [0, 0, 1, 1], [], []>} : vector<8x32xbf16>, vector<32x128xbf16>, vector<8x128xf32> -> vector<8x128xf32>
    %72 = arith.addf %69, %71 : vector<8x128xf32>
    %73 = vector.broadcast %2 : vector<1x128xf32> to vector<8x128xf32>
    %74 = arith.addf %72, %73 : vector<8x128xf32>
    %75 = math.tanh %74 : vector<8x128xf32>
    %76 = arith.negf %74 : vector<8x128xf32>
    %77 = math.exp %76 : vector<8x128xf32>
    %cst_31 = arith.constant 1.000000e+00 : f32
    %78 = vector.broadcast %cst_31 : f32 to vector<8x128xf32>
    %79 = arith.addf %78, %77 : vector<8x128xf32>
    %80 = arith.divf %78, %79 : vector<8x128xf32>
    %81 = arith.select %13, %75, %80 : vector<8x128xi1>, vector<8x128xf32>
    %82 = vector.extract_strided_slice %81 {offsets = [0, 0], sizes = [8, 32], strides = [1, 1]} : vector<8x128xf32> to vector<8x32xf32>
    %83 = vector.extract_strided_slice %81 {offsets = [0, 32], sizes = [8, 32], strides = [1, 1]} : vector<8x128xf32> to vector<8x32xf32>
    %84 = vector.extract_strided_slice %81 {offsets = [0, 64], sizes = [8, 32], strides = [1, 1]} : vector<8x128xf32> to vector<8x32xf32>
    %85 = vector.extract_strided_slice %81 {offsets = [0, 96], sizes = [8, 32], strides = [1, 1]} : vector<8x128xf32> to vector<8x32xf32>
    %86 = arith.mulf %83, %40 : vector<8x32xf32>
    %87 = arith.mulf %82, %84 : vector<8x32xf32>
    %88 = arith.addf %86, %87 : vector<8x32xf32>
    %89 = math.tanh %88 : vector<8x32xf32>
    %90 = arith.mulf %85, %89 : vector<8x32xf32>
    %91 = arith.truncf %90 : vector<8x32xf32> to vector<8x32xbf16>
    %cst_32 = arith.constant dense<0.000000e+00> : vector<8x128xf32>
    %92 = tpu.matmul %91, %3, %cst_32 {dimension_numbers = #tpu.dot_dimension_numbers<[1], [0], [0], [1], [0, 0, 1, 1], [], []>} : vector<8x32xbf16>, vector<32x128xbf16>, vector<8x128xf32> -> vector<8x128xf32>
    %93 = arith.truncf %65 : vector<8x32xf32> to vector<8x32xbf16>
    %cst_33 = arith.constant dense<0.000000e+00> : vector<8x128xf32>
    %94 = tpu.matmul %93, %4, %cst_33 {dimension_numbers = #tpu.dot_dimension_numbers<[1], [0], [0], [1], [0, 0, 1, 1], [], []>} : vector<8x32xbf16>, vector<32x128xbf16>, vector<8x128xf32> -> vector<8x128xf32>
    %95 = arith.addf %92, %94 : vector<8x128xf32>
    %96 = vector.broadcast %5 : vector<1x128xf32> to vector<8x128xf32>
    %97 = arith.addf %95, %96 : vector<8x128xf32>
    %98 = math.tanh %97 : vector<8x128xf32>
    %99 = arith.negf %97 : vector<8x128xf32>
    %100 = math.exp %99 : vector<8x128xf32>
    %cst_34 = arith.constant 1.000000e+00 : f32
    %101 = vector.broadcast %cst_34 : f32 to vector<8x128xf32>
    %102 = arith.addf %101, %100 : vector<8x128xf32>
    %103 = arith.divf %101, %102 : vector<8x128xf32>
    %104 = arith.select %13, %98, %103 : vector<8x128xi1>, vector<8x128xf32>
    %105 = vector.extract_strided_slice %104 {offsets = [0, 0], sizes = [8, 32], strides = [1, 1]} : vector<8x128xf32> to vector<8x32xf32>
    %106 = vector.extract_strided_slice %104 {offsets = [0, 32], sizes = [8, 32], strides = [1, 1]} : vector<8x128xf32> to vector<8x32xf32>
    %107 = vector.extract_strided_slice %104 {offsets = [0, 64], sizes = [8, 32], strides = [1, 1]} : vector<8x128xf32> to vector<8x32xf32>
    %108 = vector.extract_strided_slice %104 {offsets = [0, 96], sizes = [8, 32], strides = [1, 1]} : vector<8x128xf32> to vector<8x32xf32>
    %109 = arith.mulf %106, %63 : vector<8x32xf32>
    %110 = arith.mulf %105, %107 : vector<8x32xf32>
    %111 = arith.addf %109, %110 : vector<8x32xf32>
    %112 = math.tanh %111 : vector<8x32xf32>
    %113 = arith.mulf %108, %112 : vector<8x32xf32>
    %c2 = arith.constant 2 : index
    %c0_35 = arith.constant 0 : index
    %c0_36 = arith.constant 0 : index
    %114 = vector.load %arg0[%c2, %c0_35, %c0_36] : memref<8x8x16xf32, #tpu.memory_space<vmem>>, vector<1x8x16xf32>
    %115 = vector.shape_cast %114 : vector<1x8x16xf32> to vector<8x16xf32>
    %116 = arith.truncf %115 : vector<8x16xf32> to vector<8x16xbf16>
    %cst_37 = arith.constant dense<0.000000e+00> : vector<8x128xf32>
    %117 = tpu.matmul %116, %0, %cst_37 {dimension_numbers = #tpu.dot_dimension_numbers<[1], [0], [0], [1], [0, 0, 1, 1], [], []>} : vector<8x16xbf16>, vector<16x128xbf16>, vector<8x128xf32> -> vector<8x128xf32>
    %118 = arith.truncf %90 : vector<8x32xf32> to vector<8x32xbf16>
    %cst_38 = arith.constant dense<0.000000e+00> : vector<8x128xf32>
    %119 = tpu.matmul %118, %1, %cst_38 {dimension_numbers = #tpu.dot_dimension_numbers<[1], [0], [0], [1], [0, 0, 1, 1], [], []>} : vector<8x32xbf16>, vector<32x128xbf16>, vector<8x128xf32> -> vector<8x128xf32>
    %120 = arith.addf %117, %119 : vector<8x128xf32>
    %121 = vector.broadcast %2 : vector<1x128xf32> to vector<8x128xf32>
    %122 = arith.addf %120, %121 : vector<8x128xf32>
    %123 = math.tanh %122 : vector<8x128xf32>
    %124 = arith.negf %122 : vector<8x128xf32>
    %125 = math.exp %124 : vector<8x128xf32>
    %cst_39 = arith.constant 1.000000e+00 : f32
    %126 = vector.broadcast %cst_39 : f32 to vector<8x128xf32>
    %127 = arith.addf %126, %125 : vector<8x128xf32>
    %128 = arith.divf %126, %127 : vector<8x128xf32>
    %129 = arith.select %13, %123, %128 : vector<8x128xi1>, vector<8x128xf32>
    %130 = vector.extract_strided_slice %129 {offsets = [0, 0], sizes = [8, 32], strides = [1, 1]} : vector<8x128xf32> to vector<8x32xf32>
    %131 = vector.extract_strided_slice %129 {offsets = [0, 32], sizes = [8, 32], strides = [1, 1]} : vector<8x128xf32> to vector<8x32xf32>
    %132 = vector.extract_strided_slice %129 {offsets = [0, 64], sizes = [8, 32], strides = [1, 1]} : vector<8x128xf32> to vector<8x32xf32>
    %133 = vector.extract_strided_slice %129 {offsets = [0, 96], sizes = [8, 32], strides = [1, 1]} : vector<8x128xf32> to vector<8x32xf32>
    %134 = arith.mulf %131, %88 : vector<8x32xf32>
    %135 = arith.mulf %130, %132 : vector<8x32xf32>
    %136 = arith.addf %134, %135 : vector<8x32xf32>
    %137 = math.tanh %136 : vector<8x32xf32>
    %138 = arith.mulf %133, %137 : vector<8x32xf32>
    %139 = arith.truncf %138 : vector<8x32xf32> to vector<8x32xbf16>
    %cst_40 = arith.constant dense<0.000000e+00> : vector<8x128xf32>
    %140 = tpu.matmul %139, %3, %cst_40 {dimension_numbers = #tpu.dot_dimension_numbers<[1], [0], [0], [1], [0, 0, 1, 1], [], []>} : vector<8x32xbf16>, vector<32x128xbf16>, vector<8x128xf32> -> vector<8x128xf32>
    %141 = arith.truncf %113 : vector<8x32xf32> to vector<8x32xbf16>
    %cst_41 = arith.constant dense<0.000000e+00> : vector<8x128xf32>
    %142 = tpu.matmul %141, %4, %cst_41 {dimension_numbers = #tpu.dot_dimension_numbers<[1], [0], [0], [1], [0, 0, 1, 1], [], []>} : vector<8x32xbf16>, vector<32x128xbf16>, vector<8x128xf32> -> vector<8x128xf32>
    %143 = arith.addf %140, %142 : vector<8x128xf32>
    %144 = vector.broadcast %5 : vector<1x128xf32> to vector<8x128xf32>
    %145 = arith.addf %143, %144 : vector<8x128xf32>
    %146 = math.tanh %145 : vector<8x128xf32>
    %147 = arith.negf %145 : vector<8x128xf32>
    %148 = math.exp %147 : vector<8x128xf32>
    %cst_42 = arith.constant 1.000000e+00 : f32
    %149 = vector.broadcast %cst_42 : f32 to vector<8x128xf32>
    %150 = arith.addf %149, %148 : vector<8x128xf32>
    %151 = arith.divf %149, %150 : vector<8x128xf32>
    %152 = arith.select %13, %146, %151 : vector<8x128xi1>, vector<8x128xf32>
    %153 = vector.extract_strided_slice %152 {offsets = [0, 0], sizes = [8, 32], strides = [1, 1]} : vector<8x128xf32> to vector<8x32xf32>
    %154 = vector.extract_strided_slice %152 {offsets = [0, 32], sizes = [8, 32], strides = [1, 1]} : vector<8x128xf32> to vector<8x32xf32>
    %155 = vector.extract_strided_slice %152 {offsets = [0, 64], sizes = [8, 32], strides = [1, 1]} : vector<8x128xf32> to vector<8x32xf32>
    %156 = vector.extract_strided_slice %152 {offsets = [0, 96], sizes = [8, 32], strides = [1, 1]} : vector<8x128xf32> to vector<8x32xf32>
    %157 = arith.mulf %154, %111 : vector<8x32xf32>
    %158 = arith.mulf %153, %155 : vector<8x32xf32>
    %159 = arith.addf %157, %158 : vector<8x32xf32>
    %160 = math.tanh %159 : vector<8x32xf32>
    %161 = arith.mulf %156, %160 : vector<8x32xf32>
    %c3 = arith.constant 3 : index
    %c0_43 = arith.constant 0 : index
    %c0_44 = arith.constant 0 : index
    %162 = vector.load %arg0[%c3, %c0_43, %c0_44] : memref<8x8x16xf32, #tpu.memory_space<vmem>>, vector<1x8x16xf32>
    %163 = vector.shape_cast %162 : vector<1x8x16xf32> to vector<8x16xf32>
    %164 = arith.truncf %163 : vector<8x16xf32> to vector<8x16xbf16>
    %cst_45 = arith.constant dense<0.000000e+00> : vector<8x128xf32>
    %165 = tpu.matmul %164, %0, %cst_45 {dimension_numbers = #tpu.dot_dimension_numbers<[1], [0], [0], [1], [0, 0, 1, 1], [], []>} : vector<8x16xbf16>, vector<16x128xbf16>, vector<8x128xf32> -> vector<8x128xf32>
    %166 = arith.truncf %138 : vector<8x32xf32> to vector<8x32xbf16>
    %cst_46 = arith.constant dense<0.000000e+00> : vector<8x128xf32>
    %167 = tpu.matmul %166, %1, %cst_46 {dimension_numbers = #tpu.dot_dimension_numbers<[1], [0], [0], [1], [0, 0, 1, 1], [], []>} : vector<8x32xbf16>, vector<32x128xbf16>, vector<8x128xf32> -> vector<8x128xf32>
    %168 = arith.addf %165, %167 : vector<8x128xf32>
    %169 = vector.broadcast %2 : vector<1x128xf32> to vector<8x128xf32>
    %170 = arith.addf %168, %169 : vector<8x128xf32>
    %171 = math.tanh %170 : vector<8x128xf32>
    %172 = arith.negf %170 : vector<8x128xf32>
    %173 = math.exp %172 : vector<8x128xf32>
    %cst_47 = arith.constant 1.000000e+00 : f32
    %174 = vector.broadcast %cst_47 : f32 to vector<8x128xf32>
    %175 = arith.addf %174, %173 : vector<8x128xf32>
    %176 = arith.divf %174, %175 : vector<8x128xf32>
    %177 = arith.select %13, %171, %176 : vector<8x128xi1>, vector<8x128xf32>
    %178 = vector.extract_strided_slice %177 {offsets = [0, 0], sizes = [8, 32], strides = [1, 1]} : vector<8x128xf32> to vector<8x32xf32>
    %179 = vector.extract_strided_slice %177 {offsets = [0, 32], sizes = [8, 32], strides = [1, 1]} : vector<8x128xf32> to vector<8x32xf32>
    %180 = vector.extract_strided_slice %177 {offsets = [0, 64], sizes = [8, 32], strides = [1, 1]} : vector<8x128xf32> to vector<8x32xf32>
    %181 = vector.extract_strided_slice %177 {offsets = [0, 96], sizes = [8, 32], strides = [1, 1]} : vector<8x128xf32> to vector<8x32xf32>
    %182 = arith.mulf %179, %136 : vector<8x32xf32>
    %183 = arith.mulf %178, %180 : vector<8x32xf32>
    %184 = arith.addf %182, %183 : vector<8x32xf32>
    %185 = math.tanh %184 : vector<8x32xf32>
    %186 = arith.mulf %181, %185 : vector<8x32xf32>
    %187 = arith.truncf %186 : vector<8x32xf32> to vector<8x32xbf16>
    %cst_48 = arith.constant dense<0.000000e+00> : vector<8x128xf32>
    %188 = tpu.matmul %187, %3, %cst_48 {dimension_numbers = #tpu.dot_dimension_numbers<[1], [0], [0], [1], [0, 0, 1, 1], [], []>} : vector<8x32xbf16>, vector<32x128xbf16>, vector<8x128xf32> -> vector<8x128xf32>
    %189 = arith.truncf %161 : vector<8x32xf32> to vector<8x32xbf16>
    %cst_49 = arith.constant dense<0.000000e+00> : vector<8x128xf32>
    %190 = tpu.matmul %189, %4, %cst_49 {dimension_numbers = #tpu.dot_dimension_numbers<[1], [0], [0], [1], [0, 0, 1, 1], [], []>} : vector<8x32xbf16>, vector<32x128xbf16>, vector<8x128xf32> -> vector<8x128xf32>
    %191 = arith.addf %188, %190 : vector<8x128xf32>
    %192 = vector.broadcast %5 : vector<1x128xf32> to vector<8x128xf32>
    %193 = arith.addf %191, %192 : vector<8x128xf32>
    %194 = math.tanh %193 : vector<8x128xf32>
    %195 = arith.negf %193 : vector<8x128xf32>
    %196 = math.exp %195 : vector<8x128xf32>
    %cst_50 = arith.constant 1.000000e+00 : f32
    %197 = vector.broadcast %cst_50 : f32 to vector<8x128xf32>
    %198 = arith.addf %197, %196 : vector<8x128xf32>
    %199 = arith.divf %197, %198 : vector<8x128xf32>
    %200 = arith.select %13, %194, %199 : vector<8x128xi1>, vector<8x128xf32>
    %201 = vector.extract_strided_slice %200 {offsets = [0, 0], sizes = [8, 32], strides = [1, 1]} : vector<8x128xf32> to vector<8x32xf32>
    %202 = vector.extract_strided_slice %200 {offsets = [0, 32], sizes = [8, 32], strides = [1, 1]} : vector<8x128xf32> to vector<8x32xf32>
    %203 = vector.extract_strided_slice %200 {offsets = [0, 64], sizes = [8, 32], strides = [1, 1]} : vector<8x128xf32> to vector<8x32xf32>
    %204 = vector.extract_strided_slice %200 {offsets = [0, 96], sizes = [8, 32], strides = [1, 1]} : vector<8x128xf32> to vector<8x32xf32>
    %205 = arith.mulf %202, %159 : vector<8x32xf32>
    %206 = arith.mulf %201, %203 : vector<8x32xf32>
    %207 = arith.addf %205, %206 : vector<8x32xf32>
    %208 = math.tanh %207 : vector<8x32xf32>
    %209 = arith.mulf %204, %208 : vector<8x32xf32>
    %c4 = arith.constant 4 : index
    %c0_51 = arith.constant 0 : index
    %c0_52 = arith.constant 0 : index
    %210 = vector.load %arg0[%c4, %c0_51, %c0_52] : memref<8x8x16xf32, #tpu.memory_space<vmem>>, vector<1x8x16xf32>
    %211 = vector.shape_cast %210 : vector<1x8x16xf32> to vector<8x16xf32>
    %212 = arith.truncf %211 : vector<8x16xf32> to vector<8x16xbf16>
    %cst_53 = arith.constant dense<0.000000e+00> : vector<8x128xf32>
    %213 = tpu.matmul %212, %0, %cst_53 {dimension_numbers = #tpu.dot_dimension_numbers<[1], [0], [0], [1], [0, 0, 1, 1], [], []>} : vector<8x16xbf16>, vector<16x128xbf16>, vector<8x128xf32> -> vector<8x128xf32>
    %214 = arith.truncf %186 : vector<8x32xf32> to vector<8x32xbf16>
    %cst_54 = arith.constant dense<0.000000e+00> : vector<8x128xf32>
    %215 = tpu.matmul %214, %1, %cst_54 {dimension_numbers = #tpu.dot_dimension_numbers<[1], [0], [0], [1], [0, 0, 1, 1], [], []>} : vector<8x32xbf16>, vector<32x128xbf16>, vector<8x128xf32> -> vector<8x128xf32>
    %216 = arith.addf %213, %215 : vector<8x128xf32>
    %217 = vector.broadcast %2 : vector<1x128xf32> to vector<8x128xf32>
    %218 = arith.addf %216, %217 : vector<8x128xf32>
    %219 = math.tanh %218 : vector<8x128xf32>
    %220 = arith.negf %218 : vector<8x128xf32>
    %221 = math.exp %220 : vector<8x128xf32>
    %cst_55 = arith.constant 1.000000e+00 : f32
    %222 = vector.broadcast %cst_55 : f32 to vector<8x128xf32>
    %223 = arith.addf %222, %221 : vector<8x128xf32>
    %224 = arith.divf %222, %223 : vector<8x128xf32>
    %225 = arith.select %13, %219, %224 : vector<8x128xi1>, vector<8x128xf32>
    %226 = vector.extract_strided_slice %225 {offsets = [0, 0], sizes = [8, 32], strides = [1, 1]} : vector<8x128xf32> to vector<8x32xf32>
    %227 = vector.extract_strided_slice %225 {offsets = [0, 32], sizes = [8, 32], strides = [1, 1]} : vector<8x128xf32> to vector<8x32xf32>
    %228 = vector.extract_strided_slice %225 {offsets = [0, 64], sizes = [8, 32], strides = [1, 1]} : vector<8x128xf32> to vector<8x32xf32>
    %229 = vector.extract_strided_slice %225 {offsets = [0, 96], sizes = [8, 32], strides = [1, 1]} : vector<8x128xf32> to vector<8x32xf32>
    %230 = arith.mulf %227, %184 : vector<8x32xf32>
    %231 = arith.mulf %226, %228 : vector<8x32xf32>
    %232 = arith.addf %230, %231 : vector<8x32xf32>
    %233 = math.tanh %232 : vector<8x32xf32>
    %234 = arith.mulf %229, %233 : vector<8x32xf32>
    %235 = arith.truncf %234 : vector<8x32xf32> to vector<8x32xbf16>
    %cst_56 = arith.constant dense<0.000000e+00> : vector<8x128xf32>
    %236 = tpu.matmul %235, %3, %cst_56 {dimension_numbers = #tpu.dot_dimension_numbers<[1], [0], [0], [1], [0, 0, 1, 1], [], []>} : vector<8x32xbf16>, vector<32x128xbf16>, vector<8x128xf32> -> vector<8x128xf32>
    %237 = arith.truncf %209 : vector<8x32xf32> to vector<8x32xbf16>
    %cst_57 = arith.constant dense<0.000000e+00> : vector<8x128xf32>
    %238 = tpu.matmul %237, %4, %cst_57 {dimension_numbers = #tpu.dot_dimension_numbers<[1], [0], [0], [1], [0, 0, 1, 1], [], []>} : vector<8x32xbf16>, vector<32x128xbf16>, vector<8x128xf32> -> vector<8x128xf32>
    %239 = arith.addf %236, %238 : vector<8x128xf32>
    %240 = vector.broadcast %5 : vector<1x128xf32> to vector<8x128xf32>
    %241 = arith.addf %239, %240 : vector<8x128xf32>
    %242 = math.tanh %241 : vector<8x128xf32>
    %243 = arith.negf %241 : vector<8x128xf32>
    %244 = math.exp %243 : vector<8x128xf32>
    %cst_58 = arith.constant 1.000000e+00 : f32
    %245 = vector.broadcast %cst_58 : f32 to vector<8x128xf32>
    %246 = arith.addf %245, %244 : vector<8x128xf32>
    %247 = arith.divf %245, %246 : vector<8x128xf32>
    %248 = arith.select %13, %242, %247 : vector<8x128xi1>, vector<8x128xf32>
    %249 = vector.extract_strided_slice %248 {offsets = [0, 0], sizes = [8, 32], strides = [1, 1]} : vector<8x128xf32> to vector<8x32xf32>
    %250 = vector.extract_strided_slice %248 {offsets = [0, 32], sizes = [8, 32], strides = [1, 1]} : vector<8x128xf32> to vector<8x32xf32>
    %251 = vector.extract_strided_slice %248 {offsets = [0, 64], sizes = [8, 32], strides = [1, 1]} : vector<8x128xf32> to vector<8x32xf32>
    %252 = vector.extract_strided_slice %248 {offsets = [0, 96], sizes = [8, 32], strides = [1, 1]} : vector<8x128xf32> to vector<8x32xf32>
    %253 = arith.mulf %250, %207 : vector<8x32xf32>
    %254 = arith.mulf %249, %251 : vector<8x32xf32>
    %255 = arith.addf %253, %254 : vector<8x32xf32>
    %256 = math.tanh %255 : vector<8x32xf32>
    %257 = arith.mulf %252, %256 : vector<8x32xf32>
    %c5 = arith.constant 5 : index
    %c0_59 = arith.constant 0 : index
    %c0_60 = arith.constant 0 : index
    %258 = vector.load %arg0[%c5, %c0_59, %c0_60] : memref<8x8x16xf32, #tpu.memory_space<vmem>>, vector<1x8x16xf32>
    %259 = vector.shape_cast %258 : vector<1x8x16xf32> to vector<8x16xf32>
    %260 = arith.truncf %259 : vector<8x16xf32> to vector<8x16xbf16>
    %cst_61 = arith.constant dense<0.000000e+00> : vector<8x128xf32>
    %261 = tpu.matmul %260, %0, %cst_61 {dimension_numbers = #tpu.dot_dimension_numbers<[1], [0], [0], [1], [0, 0, 1, 1], [], []>} : vector<8x16xbf16>, vector<16x128xbf16>, vector<8x128xf32> -> vector<8x128xf32>
    %262 = arith.truncf %234 : vector<8x32xf32> to vector<8x32xbf16>
    %cst_62 = arith.constant dense<0.000000e+00> : vector<8x128xf32>
    %263 = tpu.matmul %262, %1, %cst_62 {dimension_numbers = #tpu.dot_dimension_numbers<[1], [0], [0], [1], [0, 0, 1, 1], [], []>} : vector<8x32xbf16>, vector<32x128xbf16>, vector<8x128xf32> -> vector<8x128xf32>
    %264 = arith.addf %261, %263 : vector<8x128xf32>
    %265 = vector.broadcast %2 : vector<1x128xf32> to vector<8x128xf32>
    %266 = arith.addf %264, %265 : vector<8x128xf32>
    %267 = math.tanh %266 : vector<8x128xf32>
    %268 = arith.negf %266 : vector<8x128xf32>
    %269 = math.exp %268 : vector<8x128xf32>
    %cst_63 = arith.constant 1.000000e+00 : f32
    %270 = vector.broadcast %cst_63 : f32 to vector<8x128xf32>
    %271 = arith.addf %270, %269 : vector<8x128xf32>
    %272 = arith.divf %270, %271 : vector<8x128xf32>
    %273 = arith.select %13, %267, %272 : vector<8x128xi1>, vector<8x128xf32>
    %274 = vector.extract_strided_slice %273 {offsets = [0, 0], sizes = [8, 32], strides = [1, 1]} : vector<8x128xf32> to vector<8x32xf32>
    %275 = vector.extract_strided_slice %273 {offsets = [0, 32], sizes = [8, 32], strides = [1, 1]} : vector<8x128xf32> to vector<8x32xf32>
    %276 = vector.extract_strided_slice %273 {offsets = [0, 64], sizes = [8, 32], strides = [1, 1]} : vector<8x128xf32> to vector<8x32xf32>
    %277 = vector.extract_strided_slice %273 {offsets = [0, 96], sizes = [8, 32], strides = [1, 1]} : vector<8x128xf32> to vector<8x32xf32>
    %278 = arith.mulf %275, %232 : vector<8x32xf32>
    %279 = arith.mulf %274, %276 : vector<8x32xf32>
    %280 = arith.addf %278, %279 : vector<8x32xf32>
    %281 = math.tanh %280 : vector<8x32xf32>
    %282 = arith.mulf %277, %281 : vector<8x32xf32>
    %283 = arith.truncf %282 : vector<8x32xf32> to vector<8x32xbf16>
    %cst_64 = arith.constant dense<0.000000e+00> : vector<8x128xf32>
    %284 = tpu.matmul %283, %3, %cst_64 {dimension_numbers = #tpu.dot_dimension_numbers<[1], [0], [0], [1], [0, 0, 1, 1], [], []>} : vector<8x32xbf16>, vector<32x128xbf16>, vector<8x128xf32> -> vector<8x128xf32>
    %285 = arith.truncf %257 : vector<8x32xf32> to vector<8x32xbf16>
    %cst_65 = arith.constant dense<0.000000e+00> : vector<8x128xf32>
    %286 = tpu.matmul %285, %4, %cst_65 {dimension_numbers = #tpu.dot_dimension_numbers<[1], [0], [0], [1], [0, 0, 1, 1], [], []>} : vector<8x32xbf16>, vector<32x128xbf16>, vector<8x128xf32> -> vector<8x128xf32>
    %287 = arith.addf %284, %286 : vector<8x128xf32>
    %288 = vector.broadcast %5 : vector<1x128xf32> to vector<8x128xf32>
    %289 = arith.addf %287, %288 : vector<8x128xf32>
    %290 = math.tanh %289 : vector<8x128xf32>
    %291 = arith.negf %289 : vector<8x128xf32>
    %292 = math.exp %291 : vector<8x128xf32>
    %cst_66 = arith.constant 1.000000e+00 : f32
    %293 = vector.broadcast %cst_66 : f32 to vector<8x128xf32>
    %294 = arith.addf %293, %292 : vector<8x128xf32>
    %295 = arith.divf %293, %294 : vector<8x128xf32>
    %296 = arith.select %13, %290, %295 : vector<8x128xi1>, vector<8x128xf32>
    %297 = vector.extract_strided_slice %296 {offsets = [0, 0], sizes = [8, 32], strides = [1, 1]} : vector<8x128xf32> to vector<8x32xf32>
    %298 = vector.extract_strided_slice %296 {offsets = [0, 32], sizes = [8, 32], strides = [1, 1]} : vector<8x128xf32> to vector<8x32xf32>
    %299 = vector.extract_strided_slice %296 {offsets = [0, 64], sizes = [8, 32], strides = [1, 1]} : vector<8x128xf32> to vector<8x32xf32>
    %300 = vector.extract_strided_slice %296 {offsets = [0, 96], sizes = [8, 32], strides = [1, 1]} : vector<8x128xf32> to vector<8x32xf32>
    %301 = arith.mulf %298, %255 : vector<8x32xf32>
    %302 = arith.mulf %297, %299 : vector<8x32xf32>
    %303 = arith.addf %301, %302 : vector<8x32xf32>
    %304 = math.tanh %303 : vector<8x32xf32>
    %305 = arith.mulf %300, %304 : vector<8x32xf32>
    %c6 = arith.constant 6 : index
    %c0_67 = arith.constant 0 : index
    %c0_68 = arith.constant 0 : index
    %306 = vector.load %arg0[%c6, %c0_67, %c0_68] : memref<8x8x16xf32, #tpu.memory_space<vmem>>, vector<1x8x16xf32>
    %307 = vector.shape_cast %306 : vector<1x8x16xf32> to vector<8x16xf32>
    %308 = arith.truncf %307 : vector<8x16xf32> to vector<8x16xbf16>
    %cst_69 = arith.constant dense<0.000000e+00> : vector<8x128xf32>
    %309 = tpu.matmul %308, %0, %cst_69 {dimension_numbers = #tpu.dot_dimension_numbers<[1], [0], [0], [1], [0, 0, 1, 1], [], []>} : vector<8x16xbf16>, vector<16x128xbf16>, vector<8x128xf32> -> vector<8x128xf32>
    %310 = arith.truncf %282 : vector<8x32xf32> to vector<8x32xbf16>
    %cst_70 = arith.constant dense<0.000000e+00> : vector<8x128xf32>
    %311 = tpu.matmul %310, %1, %cst_70 {dimension_numbers = #tpu.dot_dimension_numbers<[1], [0], [0], [1], [0, 0, 1, 1], [], []>} : vector<8x32xbf16>, vector<32x128xbf16>, vector<8x128xf32> -> vector<8x128xf32>
    %312 = arith.addf %309, %311 : vector<8x128xf32>
    %313 = vector.broadcast %2 : vector<1x128xf32> to vector<8x128xf32>
    %314 = arith.addf %312, %313 : vector<8x128xf32>
    %315 = math.tanh %314 : vector<8x128xf32>
    %316 = arith.negf %314 : vector<8x128xf32>
    %317 = math.exp %316 : vector<8x128xf32>
    %cst_71 = arith.constant 1.000000e+00 : f32
    %318 = vector.broadcast %cst_71 : f32 to vector<8x128xf32>
    %319 = arith.addf %318, %317 : vector<8x128xf32>
    %320 = arith.divf %318, %319 : vector<8x128xf32>
    %321 = arith.select %13, %315, %320 : vector<8x128xi1>, vector<8x128xf32>
    %322 = vector.extract_strided_slice %321 {offsets = [0, 0], sizes = [8, 32], strides = [1, 1]} : vector<8x128xf32> to vector<8x32xf32>
    %323 = vector.extract_strided_slice %321 {offsets = [0, 32], sizes = [8, 32], strides = [1, 1]} : vector<8x128xf32> to vector<8x32xf32>
    %324 = vector.extract_strided_slice %321 {offsets = [0, 64], sizes = [8, 32], strides = [1, 1]} : vector<8x128xf32> to vector<8x32xf32>
    %325 = vector.extract_strided_slice %321 {offsets = [0, 96], sizes = [8, 32], strides = [1, 1]} : vector<8x128xf32> to vector<8x32xf32>
    %326 = arith.mulf %323, %280 : vector<8x32xf32>
    %327 = arith.mulf %322, %324 : vector<8x32xf32>
    %328 = arith.addf %326, %327 : vector<8x32xf32>
    %329 = math.tanh %328 : vector<8x32xf32>
    %330 = arith.mulf %325, %329 : vector<8x32xf32>
    %331 = arith.truncf %330 : vector<8x32xf32> to vector<8x32xbf16>
    %cst_72 = arith.constant dense<0.000000e+00> : vector<8x128xf32>
    %332 = tpu.matmul %331, %3, %cst_72 {dimension_numbers = #tpu.dot_dimension_numbers<[1], [0], [0], [1], [0, 0, 1, 1], [], []>} : vector<8x32xbf16>, vector<32x128xbf16>, vector<8x128xf32> -> vector<8x128xf32>
    %333 = arith.truncf %305 : vector<8x32xf32> to vector<8x32xbf16>
    %cst_73 = arith.constant dense<0.000000e+00> : vector<8x128xf32>
    %334 = tpu.matmul %333, %4, %cst_73 {dimension_numbers = #tpu.dot_dimension_numbers<[1], [0], [0], [1], [0, 0, 1, 1], [], []>} : vector<8x32xbf16>, vector<32x128xbf16>, vector<8x128xf32> -> vector<8x128xf32>
    %335 = arith.addf %332, %334 : vector<8x128xf32>
    %336 = vector.broadcast %5 : vector<1x128xf32> to vector<8x128xf32>
    %337 = arith.addf %335, %336 : vector<8x128xf32>
    %338 = math.tanh %337 : vector<8x128xf32>
    %339 = arith.negf %337 : vector<8x128xf32>
    %340 = math.exp %339 : vector<8x128xf32>
    %cst_74 = arith.constant 1.000000e+00 : f32
    %341 = vector.broadcast %cst_74 : f32 to vector<8x128xf32>
    %342 = arith.addf %341, %340 : vector<8x128xf32>
    %343 = arith.divf %341, %342 : vector<8x128xf32>
    %344 = arith.select %13, %338, %343 : vector<8x128xi1>, vector<8x128xf32>
    %345 = vector.extract_strided_slice %344 {offsets = [0, 0], sizes = [8, 32], strides = [1, 1]} : vector<8x128xf32> to vector<8x32xf32>
    %346 = vector.extract_strided_slice %344 {offsets = [0, 32], sizes = [8, 32], strides = [1, 1]} : vector<8x128xf32> to vector<8x32xf32>
    %347 = vector.extract_strided_slice %344 {offsets = [0, 64], sizes = [8, 32], strides = [1, 1]} : vector<8x128xf32> to vector<8x32xf32>
    %348 = vector.extract_strided_slice %344 {offsets = [0, 96], sizes = [8, 32], strides = [1, 1]} : vector<8x128xf32> to vector<8x32xf32>
    %349 = arith.mulf %346, %303 : vector<8x32xf32>
    %350 = arith.mulf %345, %347 : vector<8x32xf32>
    %351 = arith.addf %349, %350 : vector<8x32xf32>
    %352 = math.tanh %351 : vector<8x32xf32>
    %353 = arith.mulf %348, %352 : vector<8x32xf32>
    %c7 = arith.constant 7 : index
    %c0_75 = arith.constant 0 : index
    %c0_76 = arith.constant 0 : index
    %354 = vector.load %arg0[%c7, %c0_75, %c0_76] : memref<8x8x16xf32, #tpu.memory_space<vmem>>, vector<1x8x16xf32>
    %355 = vector.shape_cast %354 : vector<1x8x16xf32> to vector<8x16xf32>
    %356 = arith.truncf %355 : vector<8x16xf32> to vector<8x16xbf16>
    %cst_77 = arith.constant dense<0.000000e+00> : vector<8x128xf32>
    %357 = tpu.matmul %356, %0, %cst_77 {dimension_numbers = #tpu.dot_dimension_numbers<[1], [0], [0], [1], [0, 0, 1, 1], [], []>} : vector<8x16xbf16>, vector<16x128xbf16>, vector<8x128xf32> -> vector<8x128xf32>
    %358 = arith.truncf %330 : vector<8x32xf32> to vector<8x32xbf16>
    %cst_78 = arith.constant dense<0.000000e+00> : vector<8x128xf32>
    %359 = tpu.matmul %358, %1, %cst_78 {dimension_numbers = #tpu.dot_dimension_numbers<[1], [0], [0], [1], [0, 0, 1, 1], [], []>} : vector<8x32xbf16>, vector<32x128xbf16>, vector<8x128xf32> -> vector<8x128xf32>
    %360 = arith.addf %357, %359 : vector<8x128xf32>
    %361 = vector.broadcast %2 : vector<1x128xf32> to vector<8x128xf32>
    %362 = arith.addf %360, %361 : vector<8x128xf32>
    %363 = math.tanh %362 : vector<8x128xf32>
    %364 = arith.negf %362 : vector<8x128xf32>
    %365 = math.exp %364 : vector<8x128xf32>
    %cst_79 = arith.constant 1.000000e+00 : f32
    %366 = vector.broadcast %cst_79 : f32 to vector<8x128xf32>
    %367 = arith.addf %366, %365 : vector<8x128xf32>
    %368 = arith.divf %366, %367 : vector<8x128xf32>
    %369 = arith.select %13, %363, %368 : vector<8x128xi1>, vector<8x128xf32>
    %370 = vector.extract_strided_slice %369 {offsets = [0, 0], sizes = [8, 32], strides = [1, 1]} : vector<8x128xf32> to vector<8x32xf32>
    %371 = vector.extract_strided_slice %369 {offsets = [0, 32], sizes = [8, 32], strides = [1, 1]} : vector<8x128xf32> to vector<8x32xf32>
    %372 = vector.extract_strided_slice %369 {offsets = [0, 64], sizes = [8, 32], strides = [1, 1]} : vector<8x128xf32> to vector<8x32xf32>
    %373 = vector.extract_strided_slice %369 {offsets = [0, 96], sizes = [8, 32], strides = [1, 1]} : vector<8x128xf32> to vector<8x32xf32>
    %374 = arith.mulf %371, %328 : vector<8x32xf32>
    %375 = arith.mulf %370, %372 : vector<8x32xf32>
    %376 = arith.addf %374, %375 : vector<8x32xf32>
    %377 = math.tanh %376 : vector<8x32xf32>
    %378 = arith.mulf %373, %377 : vector<8x32xf32>
    %379 = arith.truncf %378 : vector<8x32xf32> to vector<8x32xbf16>
    %cst_80 = arith.constant dense<0.000000e+00> : vector<8x128xf32>
    %380 = tpu.matmul %379, %3, %cst_80 {dimension_numbers = #tpu.dot_dimension_numbers<[1], [0], [0], [1], [0, 0, 1, 1], [], []>} : vector<8x32xbf16>, vector<32x128xbf16>, vector<8x128xf32> -> vector<8x128xf32>
    %381 = arith.truncf %353 : vector<8x32xf32> to vector<8x32xbf16>
    %cst_81 = arith.constant dense<0.000000e+00> : vector<8x128xf32>
    %382 = tpu.matmul %381, %4, %cst_81 {dimension_numbers = #tpu.dot_dimension_numbers<[1], [0], [0], [1], [0, 0, 1, 1], [], []>} : vector<8x32xbf16>, vector<32x128xbf16>, vector<8x128xf32> -> vector<8x128xf32>
    %383 = arith.addf %380, %382 : vector<8x128xf32>
    %384 = vector.broadcast %5 : vector<1x128xf32> to vector<8x128xf32>
    %385 = arith.addf %383, %384 : vector<8x128xf32>
    %386 = math.tanh %385 : vector<8x128xf32>
    %387 = arith.negf %385 : vector<8x128xf32>
    %388 = math.exp %387 : vector<8x128xf32>
    %cst_82 = arith.constant 1.000000e+00 : f32
    %389 = vector.broadcast %cst_82 : f32 to vector<8x128xf32>
    %390 = arith.addf %389, %388 : vector<8x128xf32>
    %391 = arith.divf %389, %390 : vector<8x128xf32>
    %392 = arith.select %13, %386, %391 : vector<8x128xi1>, vector<8x128xf32>
    %393 = vector.extract_strided_slice %392 {offsets = [0, 0], sizes = [8, 32], strides = [1, 1]} : vector<8x128xf32> to vector<8x32xf32>
    %394 = vector.extract_strided_slice %392 {offsets = [0, 32], sizes = [8, 32], strides = [1, 1]} : vector<8x128xf32> to vector<8x32xf32>
    %395 = vector.extract_strided_slice %392 {offsets = [0, 64], sizes = [8, 32], strides = [1, 1]} : vector<8x128xf32> to vector<8x32xf32>
    %396 = vector.extract_strided_slice %392 {offsets = [0, 96], sizes = [8, 32], strides = [1, 1]} : vector<8x128xf32> to vector<8x32xf32>
    %397 = arith.mulf %394, %351 : vector<8x32xf32>
    %398 = arith.mulf %393, %395 : vector<8x32xf32>
    %399 = arith.addf %397, %398 : vector<8x32xf32>
    %400 = math.tanh %399 : vector<8x32xf32>
    %401 = arith.mulf %396, %400 : vector<8x32xf32>
    %402 = arith.truncf %401 : vector<8x32xf32> to vector<8x32xbf16>
    %cst_83 = arith.constant dense<0.000000e+00> : vector<8x128xf32>
    %403 = tpu.matmul %402, %6, %cst_83 {dimension_numbers = #tpu.dot_dimension_numbers<[1], [0], [0], [1], [0, 0, 1, 1], [], []>} : vector<8x32xbf16>, vector<32x128xbf16>, vector<8x128xf32> -> vector<8x128xf32>
    %404 = vector.broadcast %7 : vector<1x128xf32> to vector<8x128xf32>
    %405 = arith.addf %403, %404 : vector<8x128xf32>
    %cst_84 = arith.constant dense<0xFF800000> : vector<8xf32>
    %406 = vector.multi_reduction <maximumf>, %405, %cst_84 [1] : vector<8x128xf32> to vector<8xf32>
    %407 = vector.shape_cast %406 : vector<8xf32> to vector<8x1xf32>
    %408 = vector.broadcast %407 : vector<8x1xf32> to vector<8x128xf32>
    %409 = arith.subf %405, %408 : vector<8x128xf32>
    %410 = math.exp %409 : vector<8x128xf32>
    %cst_85 = arith.constant dense<0.000000e+00> : vector<8xf32>
    %411 = vector.multi_reduction <add>, %410, %cst_85 [1] : vector<8x128xf32> to vector<8xf32>
    %412 = vector.shape_cast %411 : vector<8xf32> to vector<8x1xf32>
    %413 = tpu.reciprocal %412 {approx = true} : vector<8x1xf32> -> vector<8x1xf32>
    %414 = vector.broadcast %413 : vector<8x1xf32> to vector<8x128xf32>
    %415 = arith.mulf %410, %414 : vector<8x128xf32>
    %c0_86 = arith.constant 0 : index
    %c0_87 = arith.constant 0 : index
    %416 = vector.load %arg9[%c0_86, %c0_87] : memref<8x128xf32, #tpu.memory_space<vmem>>, vector<8x128xf32>
    tpu.vector_store %arg9[%c0_86, %c0_87], %415 {strides = array<i32>} : memref<8x128xf32, #tpu.memory_space<vmem>>, vector<8x128xf32>,
    return
  }
}

</mosaic_0001>

<bundles_post_ra>
// kernel: net_forward.1
= control target key start
LH: loop header
LB: loop body
LE: loop exit
PB: predicated region body
PF: predicated region fallthrough
CT: control target
= control target key end

     0   :  { %v2605_v0 = vmov 0.0   ;;  %vm2606_vm0 = vmmov 0   ;;  %vm123_vm1 = vcmask 130048   ;;  %v2607_v6 = vmov 0   ;;  %s2608_s19 = smov 64   ;;  %s2609_s20 = smov 32   ;;  %s3153_s2 = inlined_call_operand.vmem [shape: bf16[32,128], index: 2, kind: input, shape index: {}]   ;;  %s3154_s1 = inlined_call_operand.vmem [shape: bf16[16,128], index: 1, kind: input, shape index: {}]   ;;  %s3155_s0 = inlined_call_operand.vmem [shape: f32[8,8,16], index: 0, kind: input, shape index: {}]   ;;  %s3156_s3 = inlined_call_operand.vmem [shape: f32[1,128], index: 3, kind: input, shape index: {}]   ;;  %s3157_s5 = inlined_call_operand.vmem [shape: bf16[32,128], index: 5, kind: input, shape index: {}]   ;;  %s3158_s4 = inlined_call_operand.vmem [shape: bf16[32,128], index: 4, kind: input, shape index: {}]   ;;  %s3159_s6 = inlined_call_operand.vmem [shape: f32[1,128], index: 6, kind: input, shape index: {}]   ;;  %s3160_s7 = inlined_call_operand.vmem [shape: bf16[32,128], index: 7, kind: input, shape index: {}]   ;;  %s3161_s8 = inlined_call_operand.vmem [shape: f32[1,128], index: 8, kind: input, shape index: {}]   ;;  %s3162_s9 = inlined_call_operand.vmem [shape: f32[8,128], index: 9, kind: output, shape index: {}]  }
   0x1   :  { %2202 = vmatprep.subr.bf16.mxu0 %v2605_v0  ;;  %v2664_v1 = vld [vmem:[%s3153_s2] sm:$0xff]   ;;  %2210 = vmatprep.subr.bf16.mxu1 %v2605_v0  ;;  %v2680_v3 = vld [vmem:[%s3153_s2 + $0x8] sm:$0xff]   ;;  %v54_v20 = vlaneseq  ;;  %vm73_vm5 = vcmask 261120  }
   0x2   :  { %v2670_v2 = vld [vmem:[%s3154_s1] sm:$0xff]   ;;  %2212 = vmatprep.mubr.msk.bf16.mxu1 %vm2606_vm0, %v2605_v0  ;;  %2206 = vmatprep.mubr.msk.bf16.mxu0 %vm2606_vm0, %v2605_v0  ;;  %v2720_v33 = vld [vmem:[%s3157_s5 + $0x8] sm:$0xff]  }
   0x3   :  { %2203 = vmatpush3.bf16.msra.mxu0 %v2664_v1  ;;  %2211 = vmatpush3.bf16.msra.mxu1 %v2670_v2  ;;  %v59_v4 = vld [vmem:[%s3155_s0] sm:$0xff]  ;;  %v55_v22 = vand.u32 127, %v54_v20  ;;  %v2733_v35 = vld [vmem:[%s3158_s4 + $0x8] sm:$0xff]  }
   0x4   :  { %2204 = vmatprep.subr.bf16.mxu0 %v2605_v0  ;;  %v60_v5 = vpack.c.bf16 %v59_v4, %v59_v4  ;;  %2216 = vmatprep.subr.bf16.mxu1 %v2605_v0  ;;  %v2698_v10 = vld [vmem:[%s3156_s3] ss:$0 sm:$0xff]  ;;  %v2058_v45 = vld [vmem:[%s3155_s0 + $0x8] sm:$0xff] }
   0x5   :  { %vm56_vm2 = vcmp.ge.s32.totalorder %v55_v22, 64  ;;  %vm57_vm3 = vcmp.lt.s32.totalorder %v55_v22, 96  ;;  %v2715_v32 = vld [vmem:[%s3157_s5] sm:$0xff]   ;;  %v344_v46 = vpack.c.bf16 %v2058_v45, %v2058_v45  ;;  %v2463_v23 = vld [vmem:[%s3160_s7 + $0x8] sm:$0xff]  }
   0x6   :  { %2213 = vmatmul.mubr.msk.bf16.vlgmr.msra.gmra.mrb[0].mxu1 %vm123_vm1, %v60_v5  ;;  %vm2701_vm4 = vmand %vm56_vm2, %vm57_vm3  ;;  %v2726_v34 = vld [vmem:[%s3158_s4] sm:$0xff]  }
   0x7   :  { %2205 = vmatpush3.bf16.msra.mxu0 %v2680_v3  ;;  %2220 = vmatprep.mubr.msk.bf16.mxu1 %vm2606_vm0, %v2605_v0  ;;  %v2773_v47 = vld [vmem:[%s3159_s6] ss:$0 sm:$0xff] }
   0x8   :  { %2224 = vmatprep.subr.bf16.mxu0 %v2605_v0  ;;  %2217 = vmatpush3.bf16.msra.mxu1 %v2715_v32 }
   0x9   :  { %2218 = vmatprep.subr.bf16.mxu1 %v2605_v0 }
   0xa   :  { %2207 = vmatmul.mubr.bf16.vlgmr.msra.gmra.mrb[0].mxu0 %v2607_v6 }
   0xb   :  { %2228 = vmatprep.mubr.msk.bf16.mxu0 %vm2606_vm0, %v2605_v0  ;;  %2225 = vmatpush3.bf16.msra.mxu0 %v2726_v34 }
   0xc   :  { %2226 = vmatprep.subr.bf16.mxu0 %v2605_v0  ;;  %2219 = vmatpush3.bf16.msra.mxu1 %v2720_v33 }
   0xd   :  { %2232 = vmatprep.subr.bf16.mxu1 %v2605_v0 }
   0xf   :  { %2227 = vmatpush3.bf16.msra.mxu0 %v2733_v35  ;;  %2221 = vmatmul.mubr.bf16.vlgmr.msra.gmra.mrb[4].mxu1 %v2607_v6 }
  0x10   :  { %2240 = vmatprep.subr.bf16.mxu0 %v2605_v0  ;;  %2233 = vmatpush3.bf16.msra.mxu1 %v2664_v1 }
  0x11   :  { %2236 = vmatprep.mubr.msk.bf16.mxu1 %vm2606_vm0, %v2605_v0  ;;  %2234 = vmatprep.subr.bf16.mxu1 %v2605_v0 }
  0x14   :  { %2235 = vmatpush3.bf16.msra.mxu1 %v2680_v3 }
  0x15   :  { %2246 = vmatprep.subr.bf16.mxu1 %v2605_v0 }
  0xd9   :  { %v161_v7 = vpop.f32.mrb[0].mxu1 }
  0xda   :  { %v2214_v8 = vpop.f32.mrb[1].mxu1 }
  0xdb   :  { %v164_v9 = vpop.f32.mrb[2].mxu1 }
  0xdc   :  { %v2215_v12 = vpop.f32.mrb[3].mxu1 }
  0xdd   :  { %v111_v11 = vpop.f32.mrb[0].mxu0 }
  0xde   :  { %v162_v13 = vadd.f32 %v161_v7, %v111_v11  ;;  %v2208_v14 = vpop.f32.mrb[1].mxu0 }
  0xdf   :  { %v114_v15 = vpop.f32.mrb[2].mxu0 }
  0xe0   :  { %v173_v16 = vadd.f32 %v2698_v10, %v162_v13  ;;  %v2209_v17 = vpop.f32.mrb[3].mxu0 }
  0xe2   :  { %v2050_v18 = vmul.f32 -1.442695, %v173_v16  ;;  %v246_v40 = vpop.f32.mrb[4].mxu1 }
  0xe3   :  { %v2222_v41 = vpop.f32.mrb[5].mxu1 }
  0xe4   :  { %2464 = vpow2.f32 %v2050_v18  ;;  %v249_v42 = vpop.f32.mrb[6].mxu1 }
  0xe5   :  { %2466 = vtanh.f32 %v173_v16  ;;  %v2223_v43 = vpop.f32.mrb[7].mxu1  ;;  %v2065_v42 = vld [vmem:[%s3155_s0 + $0x10] sm:$0xff] }
  0xe6   :  { %v576_v43 = vpack.c.bf16 %v2065_v42, %v2065_v42 }
  0xee   :  { %v2465_v19 = vpop.eup %2464 }
  0xef   :  { %v178_v21 = vadd.f32 1.0, %v2465_v19  ;;  %v2467_v24 = vpop.eup %2466 }
  0xf1   :  { %2468 = vrcp.f32 %v178_v21 }
  0xfb   :  { %v2469_v25 = vpop.eup %2468 }
  0xfc   :  { %v181_v26 = vsel %vm2701_vm4, %v2467_v24, %v2469_v25 }
  0xfd   :  { %184 = vrot.lane.b32.xlu0 %v181_v26, %s2608_s19  ;;  %v182_v29 = vmul.f32 0.0, %v181_v26 }
 0x16f   :  { %v185_v27 = vpop.permute.xlu0 %184 }
 0x170   :  { %v187_v28 = vmul.f32 %v185_v27, %v181_v26 }
 0x172   :  { %189 = vrot.lane.b32.xlu0 %v187_v28, %s2609_s20 }
 0x1e4   :  { %v190_v30 = vpop.permute.xlu0 %189 }
 0x1e5   :  { %v2709_v31 = vadd.f32 %v190_v30, %v182_v29 }
 0x1e7   :  { %2470 = vtanh.f32 %v2709_v31 }
 0x1f1   :  { %v2471_v36 = vpop.eup %2470 }
 0x1f2   :  { %195 = vrot.lane.b32.xlu1 %v2471_v36, %s2608_s19 }
 0x264   :  { %v196_v37 = vpop.permute.xlu1 %195 }
 0x265   :  { %v198_v38 = vmul.f32 %v196_v37, %v181_v26 }
 0x267   :  { %v199_v39 = vpack.c.bf16 %v198_v38, %v198_v38 }
 0x269   :  { %253 = vrot.lane.b32.xlu1 %v199_v39, %s2609_s20 }
 0x2db   :  { %v254_v44 = vpop.permute.xlu1 %253 }
 0x2dc   :  { %2229 = vmatmul.mubr.msk.bf16.vlgmr.msra.gmra.mrb[4].mxu0 %vm73_vm5, %v254_v44  ;;  %2237 = vmatmul.mubr.msk.bf16.vlgmr.msra.gmra.mrb[8].mxu1 %vm73_vm5, %v254_v44 }
 0x2dd   :  { %2241 = vmatpush3.bf16.msra.mxu0 %v2670_v2  ;;  %2242 = vmatprep.mubr.msk.bf16.mxu0 %vm2606_vm0, %v2605_v0 }
 0x2de   :  { %2247 = vmatpush3.bf16.msra.mxu1 %v2715_v32  ;;  %2250 = vmatprep.mubr.msk.bf16.mxu1 %vm2606_vm0, %v2605_v0 }
 0x2df   :  { %2248 = vmatprep.subr.bf16.mxu1 %v2605_v0  ;;  %2254 = vmatprep.subr.bf16.mxu0 %v2605_v0 }
 0x2e2   :  { %2249 = vmatpush3.bf16.msra.mxu1 %v2720_v33 }
 0x2e3   :  { %2262 = vmatprep.subr.bf16.mxu1 %v2605_v0 }
 0x2e4   :  { %2243 = vmatmul.mubr.msk.bf16.vlgmr.msra.gmra.mrb[8].mxu0 %vm123_vm1, %v344_v46 }
 0x2e5   :  { %2255 = vmatpush3.bf16.msra.mxu0 %v2726_v34  ;;  %2258 = vmatprep.mubr.msk.bf16.mxu0 %vm2606_vm0, %v2605_v0 }
 0x2e6   :  { %2256 = vmatprep.subr.bf16.mxu0 %v2605_v0 }
 0x2e9   :  { %2257 = vmatpush3.bf16.msra.mxu0 %v2733_v35 }
 0x2ea   :  { %2270 = vmatprep.subr.bf16.mxu0 %v2605_v0 }
 0x3af   :  { %v304_v48 = vpop.f32.mrb[4].mxu0  ;;  %v379_v49 = vpop.f32.mrb[8].mxu1 }
 0x3b0   :  { %v305_v50 = vadd.f32 %v304_v48, %v246_v40  ;;  %v2230_v51 = vpop.f32.mrb[5].mxu0  ;;  %v2238_v52 = vpop.f32.mrb[9].mxu1 }
 0x3b1   :  { %v307_v53 = vpop.f32.mrb[6].mxu0  ;;  %v382_v54 = vpop.f32.mrb[10].mxu1 }
 0x3b2   :  { %v316_v55 = vadd.f32 %v2773_v47, %v305_v50  ;;  %v2231_v56 = vpop.f32.mrb[7].mxu0  ;;  %v2239_v57 = vpop.f32.mrb[11].mxu1 }
 0x3b4   :  { %v2057_v58 = vmul.f32 -1.442695, %v316_v55 }
 0x3b6   :  { %2472 = vpow2.f32 %v2057_v58 }
 0x3b7   :  { %v422_v59 = vpop.f32.mrb[8].mxu0 }
 0x3b8   :  { %v423_v60 = vadd.f32 %v422_v59, %v379_v49  ;;  %v2244_v61 = vpop.f32.mrb[9].mxu0 }
 0x3b9   :  { %v425_v62 = vpop.f32.mrb[10].mxu0 }
 0x3ba   :  { %v428_v63 = vadd.f32 %v2698_v10, %v423_v60  ;;  %v2245_v4 = vpop.f32.mrb[11].mxu0 }
 0x3bc   :  { %v2061_v5 = vmul.f32 -1.442695, %v428_v63 }
 0x3be   :  { %2474 = vpow2.f32 %v2061_v5 }
 0x3bf   :  { %2476 = vtanh.f32 %v316_v55 }
 0x3c0   :  { %v2473_v6 = vpop.eup %2472 }
 0x3c1   :  { %v321_v7 = vadd.f32 1.0, %v2473_v6 }
 0x3c3   :  { %2478 = vrcp.f32 %v321_v7 }
 0x3c4   :  { %2480 = vtanh.f32 %v428_v63 }
 0x3c8   :  { %v2475_v8 = vpop.eup %2474 }
 0x3c9   :  { %v433_v9 = vadd.f32 1.0, %v2475_v8  ;;  %v2477_v11 = vpop.eup %2476 }
 0x3cb   :  { %2482 = vrcp.f32 %v433_v9 }
 0x3cd   :  { %v2479_v12 = vpop.eup %2478 }
 0x3ce   :  { %v324_v13 = vsel %vm2701_vm4, %v2477_v11, %v2479_v12  ;;  %v2481_v14 = vpop.eup %2480 }
 0x3cf   :  { %327 = vrot.lane.b32.xlu0 %v324_v13, %s2608_s19  ;;  %v325_v21 = vmul.f32 0.0, %v324_v13 }
 0x3d5   :  { %v2483_v15 = vpop.eup %2482 }
 0x3d6   :  { %v436_v16 = vsel %vm2701_vm4, %v2481_v14, %v2483_v15 }
 0x3d7   :  { %439 = vrot.lane.b32.xlu1 %v436_v16, %s2608_s19  ;;  %v437_v25 = vmul.f32 %v436_v16, %v2709_v31 }
 0x441   :  { %v328_v17 = vpop.permute.xlu0 %327 }
 0x442   :  { %v330_v18 = vmul.f32 %v328_v17, %v324_v13 }
 0x444   :  { %332 = vrot.lane.b32.xlu0 %v330_v18, %s2609_s20 }
 0x449   :  { %v440_v19 = vpop.permute.xlu1 %439 }
 0x44a   :  { %v442_v20 = vmul.f32 %v440_v19, %v436_v16 }
 0x44c   :  { %444 = vrot.lane.b32.xlu1 %v442_v20, %s2609_s20 }
 0x4b6   :  { %v333_v22 = vpop.permute.xlu0 %332 }
 0x4b7   :  { %v2785_v24 = vadd.f32 %v333_v22, %v325_v21 }
 0x4b9   :  { %2484 = vtanh.f32 %v2785_v24 }
 0x4be   :  { %v445_v26 = vpop.permute.xlu1 %444 }
 0x4bf   :  { %v2789_v27 = vadd.f32 %v445_v26, %v437_v25 }
 0x4c1   :  { %2486 = vtanh.f32 %v2789_v27 }
 0x4c3   :  { %v2485_v28 = vpop.eup %2484 }
 0x4c4   :  { %338 = vrot.lane.b32.xlu0 %v2485_v28, %s2608_s19 }
 0x4cb   :  { %v2487_v29 = vpop.eup %2486 }
 0x4cc   :  { %450 = vrot.lane.b32.xlu1 %v2487_v29, %s2608_s19 }
 0x536   :  { %v339_v30 = vpop.permute.xlu0 %338 }
 0x537   :  { %v341_v36 = vmul.f32 %v339_v30, %v324_v13 }
 0x539   :  { %v455_v37 = vpack.c.bf16 %v341_v36, %v341_v36 }
 0x53b   :  { %457 = vrot.lane.b32.xlu0 %v455_v37, %s2609_s20 }
 0x53e   :  { %v451_v38 = vpop.permute.xlu1 %450 }
 0x53f   :  { %v453_v39 = vmul.f32 %v451_v38, %v436_v16 }
 0x541   :  { %v454_v40 = vpack.c.bf16 %v453_v39, %v453_v39 }
 0x543   :  { %503 = vrot.lane.b32.xlu1 %v454_v40, %s2609_s20 }
 0x5ad   :  { %v458_v31 = vpop.permute.xlu0 %457 }
 0x5ae   :  { %2251 = vmatmul.mubr.msk.bf16.vlgmr.msra.gmra.mrb[12].mxu1 %vm73_vm5, %v458_v31 }
 0x5af   :  { %2263 = vmatpush3.bf16.msra.mxu1 %v2664_v1  ;;  %2266 = vmatprep.mubr.msk.bf16.mxu1 %vm2606_vm0, %v2605_v0 }
 0x5b0   :  { %2264 = vmatprep.subr.bf16.mxu1 %v2605_v0 }
 0x5b3   :  { %2265 = vmatpush3.bf16.msra.mxu1 %v2680_v3 }
 0x5b4   :  { %2276 = vmatprep.subr.bf16.mxu1 %v2605_v0 }
 0x5b5   :  { %v504_v41 = vpop.permute.xlu1 %503 }
 0x5b6   :  { %2259 = vmatmul.mubr.msk.bf16.vlgmr.msra.gmra.mrb[12].mxu0 %vm73_vm5, %v504_v41  ;;  %2267 = vmatmul.mubr.msk.bf16.vlgmr.msra.gmra.mrb[16].mxu1 %vm73_vm5, %v504_v41 }
 0x5b7   :  { %2271 = vmatpush3.bf16.msra.mxu0 %v2670_v2  ;;  %2272 = vmatprep.mubr.msk.bf16.mxu0 %vm2606_vm0, %v2605_v0 }
 0x5b8   :  { %2277 = vmatpush3.bf16.msra.mxu1 %v2715_v32  ;;  %2280 = vmatprep.mubr.msk.bf16.mxu1 %vm2606_vm0, %v2605_v0 }
 0x5b9   :  { %2278 = vmatprep.subr.bf16.mxu1 %v2605_v0  ;;  %2284 = vmatprep.subr.bf16.mxu0 %v2605_v0 }
 0x5bc   :  { %2279 = vmatpush3.bf16.msra.mxu1 %v2720_v33 }
 0x5bd   :  { %2292 = vmatprep.subr.bf16.mxu1 %v2605_v0 }
 0x5be   :  { %2273 = vmatmul.mubr.msk.bf16.vlgmr.msra.gmra.mrb[16].mxu0 %vm123_vm1, %v576_v43  ;;  %v2072_v43 = vld [vmem:[%s3155_s0 + $0x18] sm:$0xff] }
 0x5bf   :  { %2285 = vmatpush3.bf16.msra.mxu0 %v2726_v34  ;;  %2288 = vmatprep.mubr.msk.bf16.mxu0 %vm2606_vm0, %v2605_v0 }
 0x5c0   :  { %2286 = vmatprep.subr.bf16.mxu0 %v2605_v0 }
 0x5c3   :  { %2287 = vmatpush3.bf16.msra.mxu0 %v2733_v35 }
 0x5c4   :  { %2300 = vmatprep.subr.bf16.mxu0 %v2605_v0 }
 0x681   :  { %v496_v44 = vpop.f32.mrb[12].mxu1 }
 0x682   :  { %v2252_v45 = vpop.f32.mrb[13].mxu1 }
 0x683   :  { %v499_v46 = vpop.f32.mrb[14].mxu1 }
 0x684   :  { %v2253_v48 = vpop.f32.mrb[15].mxu1 }
 0x689   :  { %v542_v49 = vpop.f32.mrb[12].mxu0  ;;  %v611_v50 = vpop.f32.mrb[16].mxu1 }
 0x68a   :  { %v543_v51 = vadd.f32 %v542_v49, %v496_v44  ;;  %v2260_v52 = vpop.f32.mrb[13].mxu0  ;;  %v2268_v53 = vpop.f32.mrb[17].mxu1  ;;  %v808_v44 = vpack.c.bf16 %v2072_v43, %v2072_v43 }
 0x68b   :  { %v545_v54 = vpop.f32.mrb[14].mxu0  ;;  %v614_v55 = vpop.f32.mrb[18].mxu1 }
 0x68c   :  { %v548_v56 = vadd.f32 %v2773_v47, %v543_v51  ;;  %v2261_v57 = vpop.f32.mrb[15].mxu0  ;;  %v2269_v58 = vpop.f32.mrb[19].mxu1 }
 0x68e   :  { %v2064_v59 = vmul.f32 -1.442695, %v548_v56 }
 0x690   :  { %2488 = vpow2.f32 %v2064_v59 }
 0x691   :  { %v654_v60 = vpop.f32.mrb[16].mxu0 }
 0x692   :  { %v655_v61 = vadd.f32 %v654_v60, %v611_v50  ;;  %v2274_v62 = vpop.f32.mrb[17].mxu0 }
 0x693   :  { %v657_v63 = vpop.f32.mrb[18].mxu0 }
 0x694   :  { %v660_v4 = vadd.f32 %v2698_v10, %v655_v61  ;;  %v2275_v5 = vpop.f32.mrb[19].mxu0 }
 0x696   :  { %v2068_v6 = vmul.f32 -1.442695, %v660_v4 }
 0x698   :  { %2490 = vpow2.f32 %v2068_v6 }
 0x699   :  { %2492 = vtanh.f32 %v548_v56 }
 0x69a   :  { %v2489_v7 = vpop.eup %2488 }
 0x69b   :  { %v553_v8 = vadd.f32 1.0, %v2489_v7 }
 0x69d   :  { %2494 = vrcp.f32 %v553_v8 }
 0x69e   :  { %2496 = vtanh.f32 %v660_v4 }
 0x6a2   :  { %v2491_v9 = vpop.eup %2490 }
 0x6a3   :  { %v665_v11 = vadd.f32 1.0, %v2491_v9  ;;  %v2493_v12 = vpop.eup %2492 }
 0x6a5   :  { %2498 = vrcp.f32 %v665_v11 }
 0x6a7   :  { %v2495_v13 = vpop.eup %2494 }
 0x6a8   :  { %v556_v14 = vsel %vm2701_vm4, %v2493_v12, %v2495_v13  ;;  %v2497_v15 = vpop.eup %2496 }
 0x6a9   :  { %559 = vrot.lane.b32.xlu0 %v556_v14, %s2608_s19  ;;  %v557_v22 = vmul.f32 %v556_v14, %v2785_v24 }
 0x6af   :  { %v2499_v16 = vpop.eup %2498 }
 0x6b0   :  { %v668_v17 = vsel %vm2701_vm4, %v2497_v15, %v2499_v16 }
 0x6b1   :  { %671 = vrot.lane.b32.xlu1 %v668_v17, %s2608_s19  ;;  %v669_v28 = vmul.f32 %v668_v17, %v2789_v27 }
 0x71b   :  { %v560_v18 = vpop.permute.xlu0 %559 }
 0x71c   :  { %v562_v19 = vmul.f32 %v560_v18, %v556_v14 }
 0x71e   :  { %564 = vrot.lane.b32.xlu0 %v562_v19, %s2609_s20 }
 0x723   :  { %v672_v20 = vpop.permute.xlu1 %671 }
 0x724   :  { %v674_v21 = vmul.f32 %v672_v20, %v668_v17 }
 0x726   :  { %676 = vrot.lane.b32.xlu1 %v674_v21, %s2609_s20 }
 0x790   :  { %v565_v25 = vpop.permute.xlu0 %564 }
 0x791   :  { %v2836_v26 = vadd.f32 %v565_v25, %v557_v22 }
 0x793   :  { %2500 = vtanh.f32 %v2836_v26 }
 0x798   :  { %v677_v29 = vpop.permute.xlu1 %676 }
 0x799   :  { %v2840_v30 = vadd.f32 %v677_v29, %v669_v28 }
 0x79b   :  { %2502 = vtanh.f32 %v2840_v30 }
 0x79d   :  { %v2501_v36 = vpop.eup %2500 }
 0x79e   :  { %570 = vrot.lane.b32.xlu0 %v2501_v36, %s2608_s19 }
 0x7a5   :  { %v2503_v37 = vpop.eup %2502 }
 0x7a6   :  { %682 = vrot.lane.b32.xlu1 %v2503_v37, %s2608_s19 }
 0x810   :  { %v571_v38 = vpop.permute.xlu0 %570 }
 0x811   :  { %v573_v24 = vmul.f32 %v571_v38, %v556_v14 }
 0x813   :  { %v687_v39 = vpack.c.bf16 %v573_v24, %v573_v24 }
 0x815   :  { %689 = vrot.lane.b32.xlu0 %v687_v39, %s2609_s20 }
 0x818   :  { %v683_v40 = vpop.permute.xlu1 %682 }
 0x819   :  { %v685_v31 = vmul.f32 %v683_v40, %v668_v17 }
 0x81b   :  { %v686_v41 = vpack.c.bf16 %v685_v31, %v685_v31 }
 0x81d   :  { %735 = vrot.lane.b32.xlu1 %v686_v41, %s2609_s20 }
 0x887   :  { %v690_v27 = vpop.permute.xlu0 %689 }
 0x888   :  { %2281 = vmatmul.mubr.msk.bf16.vlgmr.msra.gmra.mrb[20].mxu1 %vm73_vm5, %v690_v27 }
 0x889   :  { %2293 = vmatpush3.bf16.msra.mxu1 %v2664_v1  ;;  %2296 = vmatprep.mubr.msk.bf16.mxu1 %vm2606_vm0, %v2605_v0 }
 0x88a   :  { %2294 = vmatprep.subr.bf16.mxu1 %v2605_v0 }
 0x88d   :  { %2295 = vmatpush3.bf16.msra.mxu1 %v2680_v3 }
 0x88e   :  { %2306 = vmatprep.subr.bf16.mxu1 %v2605_v0 }
 0x88f   :  { %v736_v42 = vpop.permute.xlu1 %735 }
 0x890   :  { %2289 = vmatmul.mubr.msk.bf16.vlgmr.msra.gmra.mrb[20].mxu0 %vm73_vm5, %v736_v42  ;;  %2297 = vmatmul.mubr.msk.bf16.vlgmr.msra.gmra.mrb[24].mxu1 %vm73_vm5, %v736_v42 }
 0x891   :  { %2301 = vmatpush3.bf16.msra.mxu0 %v2670_v2  ;;  %2302 = vmatprep.mubr.msk.bf16.mxu0 %vm2606_vm0, %v2605_v0 }
 0x892   :  { %2307 = vmatpush3.bf16.msra.mxu1 %v2715_v32  ;;  %2310 = vmatprep.mubr.msk.bf16.mxu1 %vm2606_vm0, %v2605_v0 }
 0x893   :  { %2308 = vmatprep.subr.bf16.mxu1 %v2605_v0  ;;  %2314 = vmatprep.subr.bf16.mxu0 %v2605_v0 }
 0x896   :  { %2309 = vmatpush3.bf16.msra.mxu1 %v2720_v33 }
 0x897   :  { %2322 = vmatprep.subr.bf16.mxu1 %v2605_v0 }
 0x898   :  { %2303 = vmatmul.mubr.msk.bf16.vlgmr.msra.gmra.mrb[24].mxu0 %vm123_vm1, %v808_v44  ;;  %v2079_v44 = vld [vmem:[%s3155_s0 + $0x20] sm:$0xff] }
 0x899   :  { %2315 = vmatpush3.bf16.msra.mxu0 %v2726_v34  ;;  %2318 = vmatprep.mubr.msk.bf16.mxu0 %vm2606_vm0, %v2605_v0 }
 0x89a   :  { %2316 = vmatprep.subr.bf16.mxu0 %v2605_v0 }
 0x89d   :  { %2317 = vmatpush3.bf16.msra.mxu0 %v2733_v35 }
 0x89e   :  { %2330 = vmatprep.subr.bf16.mxu0 %v2605_v0 }
 0x95b   :  { %v728_v45 = vpop.f32.mrb[20].mxu1 }
 0x95c   :  { %v2282_v46 = vpop.f32.mrb[21].mxu1 }
 0x95d   :  { %v731_v48 = vpop.f32.mrb[22].mxu1 }
 0x95e   :  { %v2283_v49 = vpop.f32.mrb[23].mxu1 }
 0x963   :  { %v774_v50 = vpop.f32.mrb[20].mxu0  ;;  %v843_v51 = vpop.f32.mrb[24].mxu1 }
 0x964   :  { %v775_v52 = vadd.f32 %v774_v50, %v728_v45  ;;  %v2290_v53 = vpop.f32.mrb[21].mxu0  ;;  %v2298_v54 = vpop.f32.mrb[25].mxu1  ;;  %v1040_v45 = vpack.c.bf16 %v2079_v44, %v2079_v44 }
 0x965   :  { %v777_v55 = vpop.f32.mrb[22].mxu0  ;;  %v846_v56 = vpop.f32.mrb[26].mxu1 }
 0x966   :  { %v780_v57 = vadd.f32 %v2773_v47, %v775_v52  ;;  %v2291_v58 = vpop.f32.mrb[23].mxu0  ;;  %v2299_v59 = vpop.f32.mrb[27].mxu1 }
 0x968   :  { %v2071_v60 = vmul.f32 -1.442695, %v780_v57 }
 0x96a   :  { %2504 = vpow2.f32 %v2071_v60 }
 0x96b   :  { %v886_v61 = vpop.f32.mrb[24].mxu0 }
 0x96c   :  { %v887_v62 = vadd.f32 %v886_v61, %v843_v51  ;;  %v2304_v63 = vpop.f32.mrb[25].mxu0 }
 0x96d   :  { %v889_v4 = vpop.f32.mrb[26].mxu0 }
 0x96e   :  { %v892_v5 = vadd.f32 %v2698_v10, %v887_v62  ;;  %v2305_v6 = vpop.f32.mrb[27].mxu0 }
 0x970   :  { %v2075_v7 = vmul.f32 -1.442695, %v892_v5 }
 0x972   :  { %2506 = vpow2.f32 %v2075_v7 }
 0x973   :  { %2508 = vtanh.f32 %v780_v57 }
 0x974   :  { %v2505_v8 = vpop.eup %2504 }
 0x975   :  { %v785_v9 = vadd.f32 1.0, %v2505_v8 }
 0x977   :  { %2510 = vrcp.f32 %v785_v9 }
 0x978   :  { %2512 = vtanh.f32 %v892_v5 }
 0x97c   :  { %v2507_v11 = vpop.eup %2506 }
 0x97d   :  { %v897_v12 = vadd.f32 1.0, %v2507_v11  ;;  %v2509_v13 = vpop.eup %2508 }
 0x97f   :  { %2514 = vrcp.f32 %v897_v12 }
 0x981   :  { %v2511_v14 = vpop.eup %2510 }
 0x982   :  { %v788_v15 = vsel %vm2701_vm4, %v2509_v13, %v2511_v14  ;;  %v2513_v16 = vpop.eup %2512 }
 0x983   :  { %791 = vrot.lane.b32.xlu0 %v788_v15, %s2608_s19  ;;  %v789_v25 = vmul.f32 %v788_v15, %v2836_v26 }
 0x989   :  { %v2515_v17 = vpop.eup %2514 }
 0x98a   :  { %v900_v18 = vsel %vm2701_vm4, %v2513_v16, %v2515_v17 }
 0x98b   :  { %903 = vrot.lane.b32.xlu1 %v900_v18, %s2608_s19  ;;  %v901_v36 = vmul.f32 %v900_v18, %v2840_v30 }
 0x9f5   :  { %v792_v19 = vpop.permute.xlu0 %791 }
 0x9f6   :  { %v794_v20 = vmul.f32 %v792_v19, %v788_v15 }
 0x9f8   :  { %796 = vrot.lane.b32.xlu0 %v794_v20, %s2609_s20 }
 0x9fd   :  { %v904_v21 = vpop.permute.xlu1 %903 }
 0x9fe   :  { %v906_v22 = vmul.f32 %v904_v21, %v900_v18 }
 0xa00   :  { %908 = vrot.lane.b32.xlu1 %v906_v22, %s2609_s20 }
 0xa6a   :  { %v797_v28 = vpop.permute.xlu0 %796 }
 0xa6b   :  { %v2887_v29 = vadd.f32 %v797_v28, %v789_v25 }
 0xa6d   :  { %2516 = vtanh.f32 %v2887_v29 }
 0xa72   :  { %v909_v37 = vpop.permute.xlu1 %908 }
 0xa73   :  { %v2891_v38 = vadd.f32 %v909_v37, %v901_v36 }
 0xa75   :  { %2518 = vtanh.f32 %v2891_v38 }
 0xa77   :  { %v2517_v24 = vpop.eup %2516 }
 0xa78   :  { %802 = vrot.lane.b32.xlu0 %v2517_v24, %s2608_s19 }
 0xa7f   :  { %v2519_v39 = vpop.eup %2518 }
 0xa80   :  { %914 = vrot.lane.b32.xlu1 %v2519_v39, %s2608_s19 }
 0xaea   :  { %v803_v40 = vpop.permute.xlu0 %802 }
 0xaeb   :  { %v805_v26 = vmul.f32 %v803_v40, %v788_v15 }
 0xaed   :  { %v919_v31 = vpack.c.bf16 %v805_v26, %v805_v26 }
 0xaef   :  { %921 = vrot.lane.b32.xlu0 %v919_v31, %s2609_s20 }
 0xaf2   :  { %v915_v41 = vpop.permute.xlu1 %914 }
 0xaf3   :  { %v917_v27 = vmul.f32 %v915_v41, %v900_v18 }
 0xaf5   :  { %v918_v42 = vpack.c.bf16 %v917_v27, %v917_v27 }
 0xaf7   :  { %967 = vrot.lane.b32.xlu1 %v918_v42, %s2609_s20 }
 0xb61   :  { %v922_v30 = vpop.permute.xlu0 %921 }
 0xb62   :  { %2311 = vmatmul.mubr.msk.bf16.vlgmr.msra.gmra.mrb[28].mxu1 %vm73_vm5, %v922_v30 }
 0xb63   :  { %2323 = vmatpush3.bf16.msra.mxu1 %v2664_v1  ;;  %2326 = vmatprep.mubr.msk.bf16.mxu1 %vm2606_vm0, %v2605_v0 }
 0xb64   :  { %2324 = vmatprep.subr.bf16.mxu1 %v2605_v0 }
 0xb67   :  { %2325 = vmatpush3.bf16.msra.mxu1 %v2680_v3 }
 0xb68   :  { %2336 = vmatprep.subr.bf16.mxu1 %v2605_v0 }
 0xb69   :  { %v968_v43 = vpop.permute.xlu1 %967 }
 0xb6a   :  { %2319 = vmatmul.mubr.msk.bf16.vlgmr.msra.gmra.mrb[28].mxu0 %vm73_vm5, %v968_v43  ;;  %2327 = vmatmul.mubr.msk.bf16.vlgmr.msra.gmra.mrb[32].mxu1 %vm73_vm5, %v968_v43 }
 0xb6b   :  { %2331 = vmatpush3.bf16.msra.mxu0 %v2670_v2  ;;  %2332 = vmatprep.mubr.msk.bf16.mxu0 %vm2606_vm0, %v2605_v0 }
 0xb6c   :  { %2337 = vmatpush3.bf16.msra.mxu1 %v2715_v32  ;;  %2340 = vmatprep.mubr.msk.bf16.mxu1 %vm2606_vm0, %v2605_v0 }
 0xb6d   :  { %2338 = vmatprep.subr.bf16.mxu1 %v2605_v0  ;;  %2344 = vmatprep.subr.bf16.mxu0 %v2605_v0 }
 0xb70   :  { %2339 = vmatpush3.bf16.msra.mxu1 %v2720_v33 }
 0xb71   :  { %2352 = vmatprep.subr.bf16.mxu1 %v2605_v0 }
 0xb72   :  { %2333 = vmatmul.mubr.msk.bf16.vlgmr.msra.gmra.mrb[32].mxu0 %vm123_vm1, %v1040_v45 }
 0xb73   :  { %2345 = vmatpush3.bf16.msra.mxu0 %v2726_v34  ;;  %2348 = vmatprep.mubr.msk.bf16.mxu0 %vm2606_vm0, %v2605_v0 }
 0xb74   :  { %2346 = vmatprep.subr.bf16.mxu0 %v2605_v0 }
 0xb77   :  { %2347 = vmatpush3.bf16.msra.mxu0 %v2733_v35 }
 0xb78   :  { %2360 = vmatprep.subr.bf16.mxu0 %v2605_v0 }
 0xc35   :  { %v960_v46 = vpop.f32.mrb[28].mxu1 }
 0xc36   :  { %v2312_v48 = vpop.f32.mrb[29].mxu1 }
 0xc37   :  { %v963_v49 = vpop.f32.mrb[30].mxu1 }
 0xc38   :  { %v2313_v50 = vpop.f32.mrb[31].mxu1 }
 0xc3d   :  { %v1006_v51 = vpop.f32.mrb[28].mxu0  ;;  %v1075_v52 = vpop.f32.mrb[32].mxu1 }
 0xc3e   :  { %v1007_v53 = vadd.f32 %v1006_v51, %v960_v46  ;;  %v2320_v54 = vpop.f32.mrb[29].mxu0  ;;  %v2328_v55 = vpop.f32.mrb[33].mxu1 }
 0xc3f   :  { %v1009_v56 = vpop.f32.mrb[30].mxu0  ;;  %v1078_v57 = vpop.f32.mrb[34].mxu1 }
 0xc40   :  { %v1012_v58 = vadd.f32 %v2773_v47, %v1007_v53  ;;  %v2321_v59 = vpop.f32.mrb[31].mxu0  ;;  %v2329_v60 = vpop.f32.mrb[35].mxu1 }
 0xc42   :  { %v2078_v61 = vmul.f32 -1.442695, %v1012_v58 }
 0xc44   :  { %2520 = vpow2.f32 %v2078_v61 }
 0xc45   :  { %v1118_v62 = vpop.f32.mrb[32].mxu0 }
 0xc46   :  { %v1119_v63 = vadd.f32 %v1118_v62, %v1075_v52  ;;  %v2334_v4 = vpop.f32.mrb[33].mxu0 }
 0xc47   :  { %v1121_v5 = vpop.f32.mrb[34].mxu0 }
 0xc48   :  { %v1124_v6 = vadd.f32 %v2698_v10, %v1119_v63  ;;  %v2335_v7 = vpop.f32.mrb[35].mxu0 }
 0xc4a   :  { %v2082_v8 = vmul.f32 -1.442695, %v1124_v6 }
 0xc4c   :  { %2522 = vpow2.f32 %v2082_v8 }
 0xc4d   :  { %2524 = vtanh.f32 %v1012_v58 }
 0xc4e   :  { %v2521_v9 = vpop.eup %2520 }
 0xc4f   :  { %v1017_v11 = vadd.f32 1.0, %v2521_v9 }
 0xc51   :  { %2526 = vrcp.f32 %v1017_v11 }
 0xc52   :  { %2528 = vtanh.f32 %v1124_v6 }
 0xc56   :  { %v2523_v12 = vpop.eup %2522 }
 0xc57   :  { %v1129_v13 = vadd.f32 1.0, %v2523_v12  ;;  %v2525_v14 = vpop.eup %2524 }
 0xc59   :  { %2530 = vrcp.f32 %v1129_v13 }
 0xc5b   :  { %v2527_v15 = vpop.eup %2526 }
 0xc5c   :  { %v1020_v16 = vsel %vm2701_vm4, %v2525_v14, %v2527_v15  ;;  %v2529_v17 = vpop.eup %2528 }
 0xc5d   :  { %1023 = vrot.lane.b32.xlu0 %v1020_v16, %s2608_s19  ;;  %v1021_v28 = vmul.f32 %v1020_v16, %v2887_v29 }
 0xc63   :  { %v2531_v18 = vpop.eup %2530 }
 0xc64   :  { %v1132_v19 = vsel %vm2701_vm4, %v2529_v17, %v2531_v18 }
 0xc65   :  { %1135 = vrot.lane.b32.xlu1 %v1132_v19, %s2608_s19  ;;  %v1133_v24 = vmul.f32 %v1132_v19, %v2891_v38 }
 0xccf   :  { %v1024_v20 = vpop.permute.xlu0 %1023 }
 0xcd0   :  { %v1026_v21 = vmul.f32 %v1024_v20, %v1020_v16 }
 0xcd2   :  { %1028 = vrot.lane.b32.xlu0 %v1026_v21, %s2609_s20 }
 0xcd7   :  { %v1136_v22 = vpop.permute.xlu1 %1135 }
 0xcd8   :  { %v1138_v25 = vmul.f32 %v1136_v22, %v1132_v19 }
 0xcda   :  { %1140 = vrot.lane.b32.xlu1 %v1138_v25, %s2609_s20 }
 0xd44   :  { %v1029_v36 = vpop.permute.xlu0 %1028 }
 0xd45   :  { %v2938_v37 = vadd.f32 %v1029_v36, %v1021_v28 }
 0xd47   :  { %2532 = vtanh.f32 %v2938_v37 }
 0xd4c   :  { %v1141_v39 = vpop.permute.xlu1 %1140 }
 0xd4d   :  { %v2942_v40 = vadd.f32 %v1141_v39, %v1133_v24 }
 0xd4f   :  { %2534 = vtanh.f32 %v2942_v40 }
 0xd51   :  { %v2533_v26 = vpop.eup %2532 }
 0xd52   :  { %1034 = vrot.lane.b32.xlu0 %v2533_v26, %s2608_s19 }
 0xd59   :  { %v2535_v31 = vpop.eup %2534 }
 0xd5a   :  { %1146 = vrot.lane.b32.xlu1 %v2535_v31, %s2608_s19 }
 0xdc4   :  { %v1035_v41 = vpop.permute.xlu0 %1034 }
 0xdc5   :  { %v1037_v29 = vmul.f32 %v1035_v41, %v1020_v16 }
 0xdc7   :  { %v1151_v27 = vpack.c.bf16 %v1037_v29, %v1037_v29 }
 0xdc9   :  { %1153 = vrot.lane.b32.xlu0 %v1151_v27, %s2609_s20 }
 0xdcc   :  { %v1147_v42 = vpop.permute.xlu1 %1146 }
 0xdcd   :  { %v1149_v30 = vmul.f32 %v1147_v42, %v1132_v19 }
 0xdcf   :  { %v1150_v43 = vpack.c.bf16 %v1149_v30, %v1149_v30  ;;  %v3004_v30 = vld [vmem:[%s3153_s2] sm:$0xff]  }
 0xdd1   :  { %1199 = vrot.lane.b32.xlu1 %v1150_v43, %s2609_s20  ;;  %v3013_v43 = vld [vmem:[%s3153_s2 + $0x8] sm:$0xff]  }
 0xe3b   :  { %v1154_v38 = vpop.permute.xlu0 %1153 }
 0xe3c   :  { %2341 = vmatmul.mubr.msk.bf16.vlgmr.msra.gmra.mrb[36].mxu1 %vm73_vm5, %v1154_v38 }
 0xe3d   :  { %2353 = vmatpush3.bf16.msra.mxu1 %v2664_v1  ;;  %2356 = vmatprep.mubr.msk.bf16.mxu1 %vm2606_vm0, %v2605_v0  ;;  %v2086_v1 = vld [vmem:[%s3155_s0 + $0x28] sm:$0xff] }
 0xe3e   :  { %2354 = vmatprep.subr.bf16.mxu1 %v2605_v0 }
 0xe41   :  { %2355 = vmatpush3.bf16.msra.mxu1 %v2680_v3  ;;  %v1272_v3 = vpack.c.bf16 %v2086_v1, %v2086_v1  ;;  %v2093_v1 = vld [vmem:[%s3155_s0 + $0x30] sm:$0xff] }
 0xe42   :  { %2366 = vmatprep.subr.bf16.mxu1 %v2605_v0 }
 0xe43   :  { %v1200_v44 = vpop.permute.xlu1 %1199 }
 0xe44   :  { %2349 = vmatmul.mubr.msk.bf16.vlgmr.msra.gmra.mrb[36].mxu0 %vm73_vm5, %v1200_v44  ;;  %2357 = vmatmul.mubr.msk.bf16.vlgmr.msra.gmra.mrb[40].mxu1 %vm73_vm5, %v1200_v44  ;;  %v3022_v44 = vld [vmem:[%s3154_s1] sm:$0xff]  }
 0xe45   :  { %2361 = vmatpush3.bf16.msra.mxu0 %v2670_v2  ;;  %2362 = vmatprep.mubr.msk.bf16.mxu0 %vm2606_vm0, %v2605_v0 }
 0xe46   :  { %2367 = vmatpush3.bf16.msra.mxu1 %v2715_v32  ;;  %2370 = vmatprep.mubr.msk.bf16.mxu1 %vm2606_vm0, %v2605_v0 }
 0xe47   :  { %2368 = vmatprep.subr.bf16.mxu1 %v2605_v0  ;;  %2374 = vmatprep.subr.bf16.mxu0 %v2605_v0 }
 0xe4a   :  { %2369 = vmatpush3.bf16.msra.mxu1 %v2720_v33 }
 0xe4b   :  { %2382 = vmatprep.subr.bf16.mxu1 %v2605_v0 }
 0xe4c   :  { %2363 = vmatmul.mubr.msk.bf16.vlgmr.msra.gmra.mrb[40].mxu0 %vm123_vm1, %v1272_v3  ;;  %v1504_v3 = vpack.c.bf16 %v2093_v1, %v2093_v1 }
 0xe4d   :  { %2375 = vmatpush3.bf16.msra.mxu0 %v2726_v34  ;;  %2378 = vmatprep.mubr.msk.bf16.mxu0 %vm2606_vm0, %v2605_v0 }
 0xe4e   :  { %2376 = vmatprep.subr.bf16.mxu0 %v2605_v0 }
 0xe51   :  { %2377 = vmatpush3.bf16.msra.mxu0 %v2733_v35 }
 0xe52   :  { %2390 = vmatprep.subr.bf16.mxu0 %v2605_v0 }
 0xf0f   :  { %v1192_v2 = vpop.f32.mrb[36].mxu1 }
 0xf10   :  { %v2342_v45 = vpop.f32.mrb[37].mxu1 }
 0xf11   :  { %v1195_v46 = vpop.f32.mrb[38].mxu1 }
 0xf12   :  { %v2343_v48 = vpop.f32.mrb[39].mxu1 }
 0xf17   :  { %v1238_v49 = vpop.f32.mrb[36].mxu0  ;;  %v1307_v50 = vpop.f32.mrb[40].mxu1 }
 0xf18   :  { %v1239_v51 = vadd.f32 %v1238_v49, %v1192_v2  ;;  %v2350_v52 = vpop.f32.mrb[37].mxu0  ;;  %v2358_v53 = vpop.f32.mrb[41].mxu1 }
 0xf19   :  { %v1241_v54 = vpop.f32.mrb[38].mxu0  ;;  %v1310_v55 = vpop.f32.mrb[42].mxu1 }
 0xf1a   :  { %v1244_v56 = vadd.f32 %v2773_v47, %v1239_v51  ;;  %v2351_v57 = vpop.f32.mrb[39].mxu0  ;;  %v2359_v58 = vpop.f32.mrb[43].mxu1 }
 0xf1c   :  { %v2085_v59 = vmul.f32 -1.442695, %v1244_v56 }
 0xf1e   :  { %2536 = vpow2.f32 %v2085_v59 }
 0xf1f   :  { %v1350_v60 = vpop.f32.mrb[40].mxu0 }
 0xf20   :  { %v1351_v61 = vadd.f32 %v1350_v60, %v1307_v50  ;;  %v2364_v62 = vpop.f32.mrb[41].mxu0  ;;  %v3048_v60 = vld [vmem:[%s3156_s3] ss:$0 sm:$0xff] }
 0xf21   :  { %v1353_v63 = vpop.f32.mrb[42].mxu0 }
 0xf22   :  { %v1356_v4 = vadd.f32 %v2698_v10, %v1351_v61  ;;  %v2365_v5 = vpop.f32.mrb[43].mxu0 }
 0xf24   :  { %v2089_v6 = vmul.f32 -1.442695, %v1356_v4 }
 0xf26   :  { %2538 = vpow2.f32 %v2089_v6 }
 0xf27   :  { %2540 = vtanh.f32 %v1244_v56 }
 0xf28   :  { %v2537_v7 = vpop.eup %2536 }
 0xf29   :  { %v1249_v8 = vadd.f32 1.0, %v2537_v7 }
 0xf2b   :  { %2542 = vrcp.f32 %v1249_v8 }
 0xf2c   :  { %2544 = vtanh.f32 %v1356_v4 }
 0xf30   :  { %v2539_v9 = vpop.eup %2538 }
 0xf31   :  { %v1361_v11 = vadd.f32 1.0, %v2539_v9  ;;  %v2541_v12 = vpop.eup %2540 }
 0xf33   :  { %2546 = vrcp.f32 %v1361_v11 }
 0xf35   :  { %v2543_v13 = vpop.eup %2542 }
 0xf36   :  { %v1252_v14 = vsel %vm2701_vm4, %v2541_v12, %v2543_v13  ;;  %v2545_v15 = vpop.eup %2544 }
 0xf37   :  { %1255 = vrot.lane.b32.xlu0 %v1252_v14, %s2608_s19  ;;  %v1253_v21 = vmul.f32 %v1252_v14, %v2938_v37 }
 0xf3d   :  { %v2547_v10 = vpop.eup %2546 }
 0xf3e   :  { %v1364_v16 = vsel %vm2701_vm4, %v2545_v15, %v2547_v10 }
 0xf3f   :  { %1367 = vrot.lane.b32.xlu1 %v1364_v16, %s2608_s19  ;;  %v1365_v28 = vmul.f32 %v1364_v16, %v2942_v40 }
 0xfa9   :  { %v1256_v17 = vpop.permute.xlu0 %1255 }
 0xfaa   :  { %v1258_v18 = vmul.f32 %v1256_v17, %v1252_v14 }
 0xfac   :  { %1260 = vrot.lane.b32.xlu0 %v1258_v18, %s2609_s20 }
 0xfb1   :  { %v1368_v19 = vpop.permute.xlu1 %1367 }
 0xfb2   :  { %v1370_v20 = vmul.f32 %v1368_v19, %v1364_v16 }
 0xfb4   :  { %1372 = vrot.lane.b32.xlu1 %v1370_v20, %s2609_s20 }
0x101e   :  { %v1261_v22 = vpop.permute.xlu0 %1260 }
0x101f   :  { %v2989_v25 = vadd.f32 %v1261_v22, %v1253_v21 }
0x1021   :  { %2548 = vtanh.f32 %v2989_v25 }
0x1026   :  { %v1373_v36 = vpop.permute.xlu1 %1372 }
0x1027   :  { %v2993_v24 = vadd.f32 %v1373_v36, %v1365_v28 }
0x1029   :  { %2550 = vtanh.f32 %v2993_v24 }
0x102b   :  { %v2549_v39 = vpop.eup %2548 }
0x102c   :  { %1266 = vrot.lane.b32.xlu0 %v2549_v39, %s2608_s19 }
0x1033   :  { %v2551_v26 = vpop.eup %2550 }
0x1034   :  { %1378 = vrot.lane.b32.xlu1 %v2551_v26, %s2608_s19 }
0x109e   :  { %v1267_v31 = vpop.permute.xlu0 %1266 }
0x109f   :  { %v1269_v37 = vmul.f32 %v1267_v31, %v1252_v14 }
0x10a1   :  { %v1383_v41 = vpack.c.bf16 %v1269_v37, %v1269_v37 }
0x10a3   :  { %1385 = vrot.lane.b32.xlu0 %v1383_v41, %s2609_s20 }
0x10a6   :  { %v1379_v29 = vpop.permute.xlu1 %1378 }
0x10a7   :  { %v1381_v27 = vmul.f32 %v1379_v29, %v1364_v16 }
0x10a9   :  { %v1382_v42 = vpack.c.bf16 %v1381_v27, %v1381_v27  ;;  %v2100_v27 = vld [vmem:[%s3155_s0 + $0x38] sm:$0xff] }
0x10ab   :  { %1431 = vrot.lane.b32.xlu1 %v1382_v42, %s2609_s20  ;;  %v2600_v42 = vld [vmem:[%s3157_s5] sm:$0xff]  }
0x1115   :  { %v1386_v40 = vpop.permute.xlu0 %1385 }
0x1116   :  { %2371 = vmatmul.mubr.msk.bf16.vlgmr.msra.gmra.mrb[44].mxu1 %vm73_vm5, %v1386_v40  ;;  %v1736_v40 = vpack.c.bf16 %v2100_v27, %v2100_v27 }
0x1117   :  { %2383 = vmatpush3.bf16.msra.mxu1 %v3004_v30  ;;  %2386 = vmatprep.mubr.msk.bf16.mxu1 %vm2606_vm0, %v2605_v0 }
0x1118   :  { %2384 = vmatprep.subr.bf16.mxu1 %v2605_v0 }
0x111b   :  { %2385 = vmatpush3.bf16.msra.mxu1 %v3013_v43 }
0x111c   :  { %2396 = vmatprep.subr.bf16.mxu1 %v2605_v0 }
0x111d   :  { %v1432_v38 = vpop.permute.xlu1 %1431 }
0x111e   :  { %2379 = vmatmul.mubr.msk.bf16.vlgmr.msra.gmra.mrb[44].mxu0 %vm73_vm5, %v1432_v38  ;;  %2387 = vmatmul.mubr.msk.bf16.vlgmr.msra.gmra.mrb[48].mxu1 %vm73_vm5, %v1432_v38  ;;  %v2603_v38 = vld [vmem:[%s3158_s4 + $0x8] sm:$0xff]  }
0x111f   :  { %2391 = vmatpush3.bf16.msra.mxu0 %v3022_v44  ;;  %2392 = vmatprep.mubr.msk.bf16.mxu0 %vm2606_vm0, %v2605_v0 }
0x1120   :  { %2397 = vmatpush3.bf16.msra.mxu1 %v2715_v32  ;;  %2400 = vmatprep.mubr.msk.bf16.mxu1 %vm2606_vm0, %v2605_v0 }
0x1121   :  { %2398 = vmatprep.subr.bf16.mxu1 %v2605_v0  ;;  %2404 = vmatprep.subr.bf16.mxu0 %v2605_v0 }
0x1124   :  { %2399 = vmatpush3.bf16.msra.mxu1 %v2720_v33 }
0x1125   :  { %2412 = vmatprep.subr.bf16.mxu1 %v2605_v0 }
0x1126   :  { %2393 = vmatmul.mubr.msk.bf16.vlgmr.msra.gmra.mrb[48].mxu0 %vm123_vm1, %v1504_v3 }
0x1127   :  { %2405 = vmatpush3.bf16.msra.mxu0 %v2726_v34  ;;  %2408 = vmatprep.mubr.msk.bf16.mxu0 %vm2606_vm0, %v2605_v0 }
0x1128   :  { %2406 = vmatprep.subr.bf16.mxu0 %v2605_v0 }
0x112b   :  { %2407 = vmatpush3.bf16.msra.mxu0 %v2733_v35 }
0x112c   :  { %2420 = vmatprep.subr.bf16.mxu0 %v2605_v0 }
0x11e9   :  { %v1424_v32 = vpop.f32.mrb[44].mxu1 }
0x11ea   :  { %v2372_v2 = vpop.f32.mrb[45].mxu1 }
0x11eb   :  { %v1427_v45 = vpop.f32.mrb[46].mxu1 }
0x11ec   :  { %v2373_v46 = vpop.f32.mrb[47].mxu1 }
0x11f1   :  { %v1470_v33 = vpop.f32.mrb[44].mxu0  ;;  %v1539_v48 = vpop.f32.mrb[48].mxu1 }
0x11f2   :  { %v1471_v49 = vadd.f32 %v1470_v33, %v1424_v32  ;;  %v2380_v50 = vpop.f32.mrb[45].mxu0  ;;  %v2388_v51 = vpop.f32.mrb[49].mxu1 }
0x11f3   :  { %v1473_v52 = vpop.f32.mrb[46].mxu0  ;;  %v1542_v34 = vpop.f32.mrb[50].mxu1  ;;  %v3110_v51 = vld [vmem:[%s3159_s6] ss:$0 sm:$0xff] }
0x11f4   :  { %v1476_v53 = vadd.f32 %v2773_v47, %v1471_v49  ;;  %v2381_v54 = vpop.f32.mrb[47].mxu0  ;;  %v2389_v55 = vpop.f32.mrb[51].mxu1 }
0x11f6   :  { %v2092_v56 = vmul.f32 -1.442695, %v1476_v53 }
0x11f8   :  { %2552 = vpow2.f32 %v2092_v56 }
0x11f9   :  { %v1582_v35 = vpop.f32.mrb[48].mxu0 }
0x11fa   :  { %v1583_v57 = vadd.f32 %v1582_v35, %v1539_v48  ;;  %v2394_v58 = vpop.f32.mrb[49].mxu0 }
0x11fb   :  { %v1585_v59 = vpop.f32.mrb[50].mxu0 }
0x11fc   :  { %v1588_v61 = vadd.f32 %v3048_v60, %v1583_v57  ;;  %v2395_v62 = vpop.f32.mrb[51].mxu0 }
0x11fe   :  { %v2096_v63 = vmul.f32 -1.442695, %v1588_v61 }
0x1200   :  { %2554 = vpow2.f32 %v2096_v63 }
0x1201   :  { %2556 = vtanh.f32 %v1476_v53 }
0x1202   :  { %v2553_v4 = vpop.eup %2552 }
0x1203   :  { %v1481_v47 = vadd.f32 1.0, %v2553_v4 }
0x1205   :  { %2558 = vrcp.f32 %v1481_v47 }
0x1206   :  { %2560 = vtanh.f32 %v1588_v61 }
0x120a   :  { %v2555_v5 = vpop.eup %2554 }
0x120b   :  { %v1593_v6 = vadd.f32 1.0, %v2555_v5  ;;  %v2557_v7 = vpop.eup %2556 }
0x120d   :  { %2562 = vrcp.f32 %v1593_v6 }
0x120f   :  { %v2559_v8 = vpop.eup %2558 }
0x1210   :  { %v1484_v9 = vsel %vm2701_vm4, %v2557_v7, %v2559_v8  ;;  %v2561_v11 = vpop.eup %2560 }
0x1211   :  { %1487 = vrot.lane.b32.xlu0 %v1484_v9, %s2608_s19  ;;  %v1485_v17 = vmul.f32 %v1484_v9, %v2989_v25 }
0x1217   :  { %v2563_v12 = vpop.eup %2562 }
0x1218   :  { %v1596_v13 = vsel %vm2701_vm4, %v2561_v11, %v2563_v12 }
0x1219   :  { %1599 = vrot.lane.b32.xlu1 %v1596_v13, %s2608_s19  ;;  %v1597_v20 = vmul.f32 %v1596_v13, %v2993_v24 }
0x1283   :  { %v1488_v14 = vpop.permute.xlu0 %1487 }
0x1284   :  { %v1490_v15 = vmul.f32 %v1488_v14, %v1484_v9 }
0x1286   :  { %1492 = vrot.lane.b32.xlu0 %v1490_v15, %s2609_s20 }
0x128b   :  { %v1600_v10 = vpop.permute.xlu1 %1599 }
0x128c   :  { %v1602_v16 = vmul.f32 %v1600_v10, %v1596_v13 }
0x128e   :  { %1604 = vrot.lane.b32.xlu1 %v1602_v16, %s2609_s20 }
0x12f8   :  { %v1493_v18 = vpop.permute.xlu0 %1492 }
0x12f9   :  { %v3060_v19 = vadd.f32 %v1493_v18, %v1485_v17 }
0x12fb   :  { %2564 = vtanh.f32 %v3060_v19 }
0x1300   :  { %v1605_v21 = vpop.permute.xlu1 %1604 }
0x1301   :  { %v3064_v22 = vadd.f32 %v1605_v21, %v1597_v20 }
0x1303   :  { %2566 = vtanh.f32 %v3064_v22 }
0x1305   :  { %v2565_v28 = vpop.eup %2564 }
0x1306   :  { %1498 = vrot.lane.b32.xlu0 %v2565_v28, %s2608_s19 }
0x130d   :  { %v2567_v36 = vpop.eup %2566 }
0x130e   :  { %1610 = vrot.lane.b32.xlu1 %v2567_v36, %s2608_s19 }
0x1378   :  { %v1499_v39 = vpop.permute.xlu0 %1498 }
0x1379   :  { %v1501_v25 = vmul.f32 %v1499_v39, %v1484_v9 }
0x137b   :  { %v1615_v26 = vpack.c.bf16 %v1501_v25, %v1501_v25 }
0x137d   :  { %1617 = vrot.lane.b32.xlu0 %v1615_v26, %s2609_s20 }
0x1380   :  { %v1611_v31 = vpop.permute.xlu1 %1610 }
0x1381   :  { %v1613_v37 = vmul.f32 %v1611_v31, %v1596_v13 }
0x1383   :  { %v1614_v41 = vpack.c.bf16 %v1613_v37, %v1613_v37 }
0x1385   :  { %1663 = vrot.lane.b32.xlu1 %v1614_v41, %s2609_s20 }
0x13ef   :  { %v1618_v24 = vpop.permute.xlu0 %1617 }
0x13f0   :  { %2401 = vmatmul.mubr.msk.bf16.vlgmr.msra.gmra.mrb[52].mxu1 %vm73_vm5, %v1618_v24 }
0x13f1   :  { %2413 = vmatpush3.bf16.msra.mxu1 %v3004_v30  ;;  %2416 = vmatprep.mubr.msk.bf16.mxu1 %vm2606_vm0, %v2605_v0  ;;  %v2601_v30 = vld [vmem:[%s3157_s5 + $0x8] sm:$0xff]  }
0x13f2   :  { %2414 = vmatprep.subr.bf16.mxu1 %v2605_v0 }
0x13f5   :  { %2415 = vmatpush3.bf16.msra.mxu1 %v3013_v43  ;;  %v2602_v43 = vld [vmem:[%s3158_s4] sm:$0xff]  }
0x13f6   :  { %2426 = vmatprep.subr.bf16.mxu1 %v2605_v0 }
0x13f7   :  { %v1664_v29 = vpop.permute.xlu1 %1663 }
0x13f8   :  { %2409 = vmatmul.mubr.msk.bf16.vlgmr.msra.gmra.mrb[52].mxu0 %vm73_vm5, %v1664_v29  ;;  %2417 = vmatmul.mubr.msk.bf16.vlgmr.msra.gmra.mrb[56].mxu1 %vm73_vm5, %v1664_v29 }
0x13f9   :  { %2421 = vmatpush3.bf16.msra.mxu0 %v3022_v44  ;;  %2422 = vmatprep.mubr.msk.bf16.mxu0 %vm2606_vm0, %v2605_v0 }
0x13fa   :  { %2427 = vmatpush3.bf16.msra.mxu1 %v2600_v42  ;;  %2430 = vmatprep.mubr.msk.bf16.mxu1 %vm2606_vm0, %v2605_v0 }
0x13fb   :  { %2428 = vmatprep.subr.bf16.mxu1 %v2605_v0  ;;  %2434 = vmatprep.subr.bf16.mxu0 %v2605_v0 }
0x13fe   :  { %2429 = vmatpush3.bf16.msra.mxu1 %v2601_v30 }
0x13ff   :  { %2442 = vmatprep.subr.bf16.mxu1 %v2605_v0 }
0x1400   :  { %2423 = vmatmul.mubr.msk.bf16.vlgmr.msra.gmra.mrb[56].mxu0 %vm123_vm1, %v1736_v40 }
0x1401   :  { %2435 = vmatpush3.bf16.msra.mxu0 %v2602_v43  ;;  %2438 = vmatprep.mubr.msk.bf16.mxu0 %vm2606_vm0, %v2605_v0 }
0x1402   :  { %2436 = vmatprep.subr.bf16.mxu0 %v2605_v0 }
0x1405   :  { %2437 = vmatpush3.bf16.msra.mxu0 %v2603_v38 }
0x14c3   :  { %v1656_v44 = vpop.f32.mrb[52].mxu1 }
0x14c4   :  { %v2402_v1 = vpop.f32.mrb[53].mxu1 }
0x14c5   :  { %v1659_v3 = vpop.f32.mrb[54].mxu1 }
0x14c6   :  { %v2403_v32 = vpop.f32.mrb[55].mxu1 }
0x14cb   :  { %v1702_v2 = vpop.f32.mrb[52].mxu0  ;;  %v1771_v45 = vpop.f32.mrb[56].mxu1 }
0x14cc   :  { %v1703_v46 = vadd.f32 %v1702_v2, %v1656_v44  ;;  %v2410_v33 = vpop.f32.mrb[53].mxu0  ;;  %v2418_v48 = vpop.f32.mrb[57].mxu1 }
0x14cd   :  { %v1705_v49 = vpop.f32.mrb[54].mxu0  ;;  %v1774_v50 = vpop.f32.mrb[58].mxu1 }
0x14ce   :  { %v1708_v52 = vadd.f32 %v3110_v51, %v1703_v46  ;;  %v2411_v34 = vpop.f32.mrb[55].mxu0  ;;  %v2419_v53 = vpop.f32.mrb[59].mxu1 }
0x14d0   :  { %v2099_v54 = vmul.f32 -1.442695, %v1708_v52 }
0x14d2   :  { %2568 = vpow2.f32 %v2099_v54 }
0x14d3   :  { %v1814_v55 = vpop.f32.mrb[56].mxu0 }
0x14d4   :  { %v1815_v56 = vadd.f32 %v1814_v55, %v1771_v45  ;;  %v2424_v35 = vpop.f32.mrb[57].mxu0 }
0x14d5   :  { %v1817_v57 = vpop.f32.mrb[58].mxu0  ;;  %v2107_v35 = vld [vmem:[%s3161_s8] ss:$0 sm:$0xff] }
0x14d6   :  { %v1820_v58 = vadd.f32 %v3048_v60, %v1815_v56  ;;  %v2425_v59 = vpop.f32.mrb[59].mxu0 }
0x14d8   :  { %v2103_v61 = vmul.f32 -1.442695, %v1820_v58 }
0x14da   :  { %2570 = vpow2.f32 %v2103_v61 }
0x14db   :  { %2572 = vtanh.f32 %v1708_v52  ;;  %v2462_v52 = vld [vmem:[%s3160_s7] sm:$0xff]  }
0x14dc   :  { %v2569_v62 = vpop.eup %2568 }
0x14dd   :  { %v1713_v63 = vadd.f32 1.0, %v2569_v62 }
0x14df   :  { %2574 = vrcp.f32 %v1713_v63 }
0x14e0   :  { %2576 = vtanh.f32 %v1820_v58 }
0x14e4   :  { %v2571_v4 = vpop.eup %2570 }
0x14e5   :  { %v1825_v47 = vadd.f32 1.0, %v2571_v4  ;;  %v2573_v5 = vpop.eup %2572 }
0x14e7   :  { %2578 = vrcp.f32 %v1825_v47 }
0x14e9   :  { %v2575_v6 = vpop.eup %2574 }
0x14ea   :  { %v1716_v7 = vsel %vm2701_vm4, %v2573_v5, %v2575_v6  ;;  %v2577_v8 = vpop.eup %2576 }
0x14eb   :  { %1719 = vrot.lane.b32.xlu0 %v1716_v7, %s2608_s19  ;;  %v1717_v15 = vmul.f32 %v1716_v7, %v3060_v19 }
0x14f1   :  { %v2579_v60 = vpop.eup %2578 }
0x14f2   :  { %v1828_v9 = vsel %vm2701_vm4, %v2577_v8, %v2579_v60 }
0x14f3   :  { %1831 = vrot.lane.b32.xlu1 %v1828_v9, %s2608_s19  ;;  %v1829_v17 = vmul.f32 %v1828_v9, %v3064_v22 }
0x155d   :  { %v1720_v11 = vpop.permute.xlu0 %1719 }
0x155e   :  { %v1722_v12 = vmul.f32 %v1720_v11, %v1716_v7 }
0x1560   :  { %1724 = vrot.lane.b32.xlu0 %v1722_v12, %s2609_s20 }
0x1565   :  { %v1832_v13 = vpop.permute.xlu1 %1831 }
0x1566   :  { %v1834_v14 = vmul.f32 %v1832_v13, %v1828_v9 }
0x1568   :  { %1836 = vrot.lane.b32.xlu1 %v1834_v14, %s2609_s20 }
0x15d2   :  { %v1725_v10 = vpop.permute.xlu0 %1724 }
0x15d3   :  { %v1727_v16 = vadd.f32 %v1725_v10, %v1717_v15 }
0x15d5   :  { %2580 = vtanh.f32 %v1727_v16 }
0x15da   :  { %v1837_v18 = vpop.permute.xlu1 %1836 }
0x15db   :  { %v1839_v20 = vadd.f32 %v1837_v18, %v1829_v17 }
0x15dd   :  { %2582 = vtanh.f32 %v1839_v20 }
0x15df   :  { %v2581_v21 = vpop.eup %2580 }
0x15e0   :  { %1730 = vrot.lane.b32.xlu0 %v2581_v21, %s2608_s19 }
0x15e7   :  { %v2583_v28 = vpop.eup %2582 }
0x15e8   :  { %1842 = vrot.lane.b32.xlu1 %v2583_v28, %s2608_s19 }
0x1652   :  { %v1731_v36 = vpop.permute.xlu0 %1730 }
0x1653   :  { %v1733_v39 = vmul.f32 %v1731_v36, %v1716_v7 }
0x1655   :  { %v1847_v25 = vpack.c.bf16 %v1733_v39, %v1733_v39 }
0x1657   :  { %1849 = vrot.lane.b32.xlu0 %v1847_v25, %s2609_s20 }
0x165a   :  { %v1843_v19 = vpop.permute.xlu1 %1842 }
0x165b   :  { %v1845_v26 = vmul.f32 %v1843_v19, %v1828_v9 }
0x165d   :  { %v1846_v31 = vpack.c.bf16 %v1845_v26, %v1845_v26 }
0x165f   :  { %1895 = vrot.lane.b32.xlu1 %v1846_v31, %s2609_s20 }
0x16c9   :  { %v1850_v22 = vpop.permute.xlu0 %1849 }
0x16ca   :  { %2431 = vmatmul.mubr.msk.bf16.vlgmr.msra.gmra.mrb[60].mxu1 %vm73_vm5, %v1850_v22 }
0x16cb   :  { %2446 = vmatprep.mubr.msk.bf16.mxu1 %vm2606_vm0, %v2605_v0  ;;  %2443 = vmatpush3.bf16.msra.mxu1 %v2462_v52 }
0x16cc   :  { %2444 = vmatprep.subr.bf16.mxu1 %v2605_v0 }
0x16cf   :  { %2445 = vmatpush3.bf16.msra.mxu1 %v2463_v23 }
0x16d1   :  { %v1896_v37 = vpop.permute.xlu1 %1895 }
0x16d2   :  { %2439 = vmatmul.mubr.msk.bf16.vlgmr.msra.gmra.mrb[60].mxu0 %vm73_vm5, %v1896_v37 }
0x179d   :  { %v1888_v41 = vpop.f32.mrb[60].mxu1 }
0x179e   :  { %v2432_v24 = vpop.f32.mrb[61].mxu1 }
0x179f   :  { %v1891_v29 = vpop.f32.mrb[62].mxu1 }
0x17a0   :  { %v2433_v27 = vpop.f32.mrb[63].mxu1 }
0x17a5   :  { %v1934_v42 = vpop.f32.mrb[60].mxu0 }
0x17a6   :  { %v1935_v40 = vadd.f32 %v1934_v42, %v1888_v41  ;;  %v2440_v30 = vpop.f32.mrb[61].mxu0 }
0x17a7   :  { %v1937_v43 = vpop.f32.mrb[62].mxu0 }
0x17a8   :  { %v1940_v38 = vadd.f32 %v3110_v51, %v1935_v40  ;;  %v2441_v44 = vpop.f32.mrb[63].mxu0 }
0x17aa   :  { %v2106_v1 = vmul.f32 -1.442695, %v1940_v38 }
0x17ac   :  { %2584 = vpow2.f32 %v2106_v1 }
0x17ad   :  { %2586 = vtanh.f32 %v1940_v38 }
0x17b6   :  { %v2585_v3 = vpop.eup %2584 }
0x17b7   :  { %v1945_v32 = vadd.f32 1.0, %v2585_v3  ;;  %v2587_v2 = vpop.eup %2586 }
0x17b9   :  { %2588 = vrcp.f32 %v1945_v32 }
0x17c3   :  { %v2589_v45 = vpop.eup %2588 }
0x17c4   :  { %v1948_v46 = vsel %vm2701_vm4, %v2587_v2, %v2589_v45 }
0x17c5   :  { %1951 = vrot.lane.b32.xlu0 %v1948_v46, %s2608_s19  ;;  %v1949_v49 = vmul.f32 %v1948_v46, %v1727_v16 }
0x1837   :  { %v1952_v33 = vpop.permute.xlu0 %1951 }
0x1838   :  { %v1954_v48 = vmul.f32 %v1952_v33, %v1948_v46 }
0x183a   :  { %1956 = vrot.lane.b32.xlu1 %v1954_v48, %s2609_s20 }
0x18ac   :  { %v1957_v50 = vpop.permute.xlu1 %1956 }
0x18ad   :  { %v1959_v51 = vadd.f32 %v1957_v50, %v1949_v49 }
0x18af   :  { %2590 = vtanh.f32 %v1959_v51 }
0x18b9   :  { %v2591_v34 = vpop.eup %2590 }
0x18ba   :  { %1962 = vrot.lane.b32.xlu0 %v2591_v34, %s2608_s19 }
0x192c   :  { %v1963_v53 = vpop.permute.xlu0 %1962 }
0x192d   :  { %v1965_v54 = vmul.f32 %v1963_v53, %v1948_v46 }
0x192f   :  { %v1966_v55 = vpack.c.bf16 %v1965_v54, %v1965_v54 }
0x1931   :  { %1974 = vrot.lane.b32.xlu1 %v1966_v55, %s2609_s20 }
0x19a3   :  { %v1975_v56 = vpop.permute.xlu1 %1974 }
0x19a4   :  { %2447 = vmatmul.mubr.msk.bf16.vlgmr.msra.gmra.mrb[64].mxu1 %vm73_vm5, %v1975_v56 }
0x1a77   :  { %v2025_v57 = vpop.f32.mrb[64].mxu1 }
0x1a78   :  { %v2026_v58 = vadd.f32 %v2107_v35, %v2025_v57  ;;  %v2448_v59 = vpop.f32.mrb[65].mxu1 }
0x1a79   :  { %v2028_v0 = vpop.f32.mrb[66].mxu1 }
0x1a7a   :  { %2031 = vmax.xlane.f32.xlu0 %v2026_v58  ;;  %v2449_v61 = vpop.f32.mrb[67].mxu1 }
0x1b07   :  { %v2032_v62 = vpop.xlane.xlu0 %2031 }
0x1b08   :  { %v2033_v63 = vsub.f32 %v2026_v58, %v2032_v62 }
0x1b0a   :  { %v2034_v4 = vmul.f32 1.442695, %v2033_v63 }
0x1b0c   :  { %2592 = vpow2.f32 %v2034_v4 }
0x1b16   :  { %v2593_v47 = vpop.eup %2592 }
0x1b17   :  { %2036 = vadd.xlane.f32.xlu1 %v2593_v47 }
0x1ba4   :  { %v2037_v5 = vpop.xlane.xlu1 %2036 }
0x1ba5   :  { %2594 = vrcp.f32 %v2037_v5 }
0x1baf   :  { %v2595_v6 = vpop.eup %2594 }
0x1bb0   :  { %v2039_v7 = vmul.f32 %v2595_v6, %v2593_v47 }
0x1bb2   :  { %2040 = vst [vmem:[%s3162_s9] sm:$0xff] %v2039_v7 }

</bundles_post_ra>
